<compile_context>
chip_gen: v6e
topology: v6e:2x2x1
jax: 0.10.0
libtpu: 0.0.40
codegen_flags: <defaults>
</compile_context>

<pallas_src>
import functools
import math

import jax
import jax.numpy as jnp
from jax.experimental import pallas as pl
from jax.experimental.pallas import tpu as pltpu


# ---------------------------------------------------------------------------
# In-kernel helpers (traced inside the Pallas kernel body).
# ---------------------------------------------------------------------------
def _layernorm(x, gamma, beta, eps=1e-5):
    # One-pass LN: mean and E[x^2] are independent reductions; biased variance
    # and eps=1e-5 match nn.LayerNorm defaults.
    mean = jnp.mean(x, axis=-1, keepdims=True)
    mean_sq = jnp.mean(x * x, axis=-1, keepdims=True)
    var = mean_sq - mean * mean
    return (x - mean) * jax.lax.rsqrt(var + eps) * gamma + beta


def _proj(x, w, b, mxu_dtype):
    """x: (R, K) f32, w: (K, N) already in mxu_dtype, b: (1, N) f32."""
    return jnp.dot(x.astype(mxu_dtype), w,
                   preferred_element_type=jnp.float32) + b


def _mha_core(qp, kp, vp, wo, bo, nhead, mxu_dtype):
    """Multi-head attention on already-projected activations of ONE batch elem.

    qp: (Lq, E) f32 (1/sqrt(hd) already folded into Wq), kp/vp: (Lk, E) f32,
    wo: (E, E) in mxu_dtype (pre-transposed), bo: (1, E) f32.
    """
    E = qp.shape[-1]
    hd = E // nhead

    # Head split: static lane slices stacked on a leading (batch) dim.
    q3 = jnp.stack([qp[:, h * hd:(h + 1) * hd] for h in range(nhead)], axis=0)
    k3 = jnp.stack([kp[:, h * hd:(h + 1) * hd] for h in range(nhead)], axis=0)
    v3 = jnp.stack([vp[:, h * hd:(h + 1) * hd] for h in range(nhead)], axis=0)

    s = jnp.einsum('hqd,hkd->hqk', q3.astype(mxu_dtype), k3.astype(mxu_dtype),
                   preferred_element_type=jnp.float32)        # (H, Lq, Lk)
    s = s - jnp.max(s, axis=-1, keepdims=True)
    p = jnp.exp(s)
    # EUP approximate reciprocal for the softmax denominator (inference-grade;
    # switch to an exact divide for logit-sensitive / training paths).
    p = p * pl.reciprocal(jnp.sum(p, axis=-1, keepdims=True), approx=True)

    o3 = jnp.einsum('hqk,hkd->hqd', p.astype(mxu_dtype), v3.astype(mxu_dtype),
                    preferred_element_type=jnp.float32)       # (H, Lq, hd)

    # Reassemble heads along lanes and run ONE fused K=E output projection
    # (replaces H K=hd MXU passes + (H, Lq, E) temp + head-sum).
    o = jnp.concatenate([o3[h] for h in range(nhead)], axis=-1)   # (Lq, E)
    return jnp.dot(o.astype(mxu_dtype), wo,
                   preferred_element_type=jnp.float32) + bo


# ---------------------------------------------------------------------------
# Pallas kernel: one full decoder layer for ONE batch element per grid step.
# ---------------------------------------------------------------------------
def _decoder_layer_kernel(
    # per-batch activation blocks
    tgt_ref, qpos_ref, mem_ref, pos_ref,
    # self-attention weights (resident)
    sa_wqk_ref, sa_bqk_ref, sa_wv_ref, sa_bv_ref, sa_wo_ref, sa_bo_ref,
    # cross-attention weights (resident)
    ca_wq_ref, ca_bq_ref, ca_wk_ref, ca_bk_ref, ca_wv_ref, ca_bv_ref,
    ca_wo_ref, ca_bo_ref,
    # FFN weights (resident)
    w1_ref, b1_ref, w2_ref, b2_ref,
    # layernorm params (resident)
    g1_ref, be1_ref, g2_ref, be2_ref, g3_ref, be3_ref,
    # output block
    out_ref,
    *, nhead, mxu_dtype,
):
    E = tgt_ref.shape[-1]

    tgt = tgt_ref[...]      # (L, E)
    qpos = qpos_ref[...]    # (L, E)
    mem = mem_ref[...]      # (S, E)
    pos = pos_ref[...]      # (S, E)

    # --- self attention (q = k = tgt + query_pos, v = tgt) ---
    q_in = tgt + qpos
    qk = _proj(q_in, sa_wqk_ref[...], sa_bqk_ref[...], mxu_dtype)   # (L, 2E)
    vp = _proj(tgt, sa_wv_ref[...], sa_bv_ref[...], mxu_dtype)      # (L, E)
    sa = _mha_core(qk[:, :E], qk[:, E:], vp,
                   sa_wo_ref[...], sa_bo_ref[...], nhead, mxu_dtype)
    x = _layernorm(tgt + sa, g1_ref[...], be1_ref[...])     # dropout1 == id

    # --- cross attention (q = x + query_pos, k = memory + pos, v = memory) ---
    qp = _proj(x + qpos, ca_wq_ref[...], ca_bq_ref[...], mxu_dtype)
    kp = _proj(mem + pos, ca_wk_ref[...], ca_bk_ref[...], mxu_dtype)
    vp2 = _proj(mem, ca_wv_ref[...], ca_bv_ref[...], mxu_dtype)
    ca = _mha_core(qp, kp, vp2,
                   ca_wo_ref[...], ca_bo_ref[...], nhead, mxu_dtype)
    x = _layernorm(x + ca, g2_ref[...], be2_ref[...])        # dropout2 == id

    # --- feed-forward (relu) ---
    h = jnp.maximum(_proj(x, w1_ref[...], b1_ref[...], mxu_dtype), 0.0)
    f = _proj(h, w2_ref[...], b2_ref[...], mxu_dtype)
    x = _layernorm(x + f, g3_ref[...], be3_ref[...])         # dropout3 == id

    out_ref[...] = x.astype(out_ref.dtype)


# ---------------------------------------------------------------------------
# One-time weight prep (hoisted out of the per-call path).
# ---------------------------------------------------------------------------
def prepare_params(params, *, nhead, mxu_dtype=jnp.bfloat16):
    """Pre-transpose, fuse self-attn Wq|Wk, fold 1/sqrt(hd) into Wq/bq, cast
    MXU operands.  Call ONCE per set of weights; feed the result to
    transformer_decoder_layer."""
    f32 = jnp.float32
    E = params["sa_wq"].shape[0]
    assert E % nhead == 0
    hd = E // nhead
    scale = 1.0 / math.sqrt(hd)

    prep = {
        # self attention: fused (E, 2E) Wq|Wk with the softmax scale folded
        # into the Wq half (and bq), plus Wv and the (E, E) output projection.
        "sa_wqk": jnp.concatenate([params["sa_wq"].T * scale,
                                   params["sa_wk"].T], axis=1).astype(mxu_dtype),
        "sa_bqk": jnp.concatenate([params["sa_bq"] * scale,
                                   params["sa_bk"]], axis=1).astype(f32),
        "sa_wv": params["sa_wv"].T.astype(mxu_dtype),
        "sa_bv": params["sa_bv"].astype(f32),
        "sa_wo": params["sa_wo"].T.astype(mxu_dtype),
        "sa_bo": params["sa_bo"].astype(f32),
        # cross attention
        "ca_wq": (params["ca_wq"].T * scale).astype(mxu_dtype),
        "ca_bq": (params["ca_bq"] * scale).astype(f32),
        "ca_wk": params["ca_wk"].T.astype(mxu_dtype),
        "ca_bk": params["ca_bk"].astype(f32),
        "ca_wv": params["ca_wv"].T.astype(mxu_dtype),
        "ca_bv": params["ca_bv"].astype(f32),
        "ca_wo": params["ca_wo"].T.astype(mxu_dtype),
        "ca_bo": params["ca_bo"].astype(f32),
        # FFN
        "w1": params["w1"].T.astype(mxu_dtype),   # (E, F)
        "b1": params["b1"].astype(f32),
        "w2": params["w2"].T.astype(mxu_dtype),   # (F, E)
        "b2": params["b2"].astype(f32),
        # layernorms (always f32 — vector math stays f32 on all generations)
        "g1": params["g1"].astype(f32), "be1": params["be1"].astype(f32),
        "g2": params["g2"].astype(f32), "be2": params["be2"].astype(f32),
        "g3": params["g3"].astype(f32), "be3": params["be3"].astype(f32),
    }
    return prep


# ---------------------------------------------------------------------------
# Per-call wrapper
# ---------------------------------------------------------------------------
def transformer_decoder_layer(tgt, memory, query_pos, pos, prep, *, nhead):
    """tgt/query_pos: (L, N, E), memory/pos: (S, N, E).  Returns (L, N, E)."""
    L, N, E = tgt.shape
    S = memory.shape[0]
    mxu_dtype = prep["sa_wqk"].dtype

    # (seq, batch, E) -> (batch, seq, E): batch becomes the parallel grid axis.
    tgt_b = jnp.transpose(tgt, (1, 0, 2))
    qpos_b = jnp.transpose(query_pos, (1, 0, 2))
    mem_b = jnp.transpose(memory, (1, 0, 2))
    pos_b = jnp.transpose(pos, (1, 0, 2))

    def act_spec(seq):
        # Squeeze the batch dim out of the kernel view -> (seq, E).
        return pl.BlockSpec((None, seq, E), lambda i: (i, 0, 0))

    def w_spec(arr):
        # Full-array block, constant index -> resident in VMEM, DMA'd once.
        return pl.BlockSpec(arr.shape, lambda i: (0, 0))

    weights = (prep["sa_wqk"], prep["sa_bqk"], prep["sa_wv"], prep["sa_bv"],
               prep["sa_wo"], prep["sa_bo"],
               prep["ca_wq"], prep["ca_bq"], prep["ca_wk"], prep["ca_bk"],
               prep["ca_wv"], prep["ca_bv"], prep["ca_wo"], prep["ca_bo"],
               prep["w1"], prep["b1"], prep["w2"], prep["b2"],
               prep["g1"], prep["be1"], prep["g2"], prep["be2"],
               prep["g3"], prep["be3"])

    in_specs = ([act_spec(L), act_spec(L), act_spec(S), act_spec(S)]
                + [w_spec(w) for w in weights])

    out = pl.pallas_call(
        functools.partial(_decoder_layer_kernel, nhead=nhead,
                          mxu_dtype=mxu_dtype),
        out_shape=jax.ShapeDtypeStruct((N, L, E), jnp.float32),
        grid=(N,),
        in_specs=in_specs,
        out_specs=pl.BlockSpec((None, L, E), lambda i: (i, 0, 0)),
        compiler_params=pltpu.CompilerParams(
            # Batch elements are independent -> shard across TensorCores (v7x).
            dimension_semantics=("parallel",),
            # Explicit scoped-VMEM budget (v5e default is only 16 MiB).
            vmem_limit_bytes=32 * 1024 * 1024,
        ),
    )(tgt_b, qpos_b, mem_b, pos_b, *weights)

    # Back to PyTorch's (L, N, E) layout.
    return jnp.transpose(out, (1, 0, 2))


# ---------------------------------------------------------------------------
# Pure-JAX reference (for correctness check)
# ---------------------------------------------------------------------------
def _ref_layer(tgt, memory, p, query_pos, pos, nhead):
    def ln(x, g, b):
        m = x.mean(-1, keepdims=True)
        v = ((x - m) ** 2).mean(-1, keepdims=True)
        return (x - m) / jnp.sqrt(v + 1e-5) * g + b

    def mha(q, k, v, wq, wk, wv, bq, bk, bv, wo, bo):
        Lq, N, E = q.shape
        Lk = k.shape[0]
        hd = E // nhead
        qp = q @ wq.T + bq
        kp = k @ wk.T + bk
        vp = v @ wv.T + bv
        qp = qp.reshape(Lq, N, nhead, hd).transpose(1, 2, 0, 3)
        kp = kp.reshape(Lk, N, nhead, hd).transpose(1, 2, 0, 3)
        vp = vp.reshape(Lk, N, nhead, hd).transpose(1, 2, 0, 3)
        s = jnp.einsum("bhqd,bhkd->bhqk", qp / math.sqrt(hd), kp)
        a = jax.nn.softmax(s, axis=-1)
        o = jnp.einsum("bhqk,bhkd->bhqd", a, vp)
        o = o.transpose(2, 0, 1, 3).reshape(Lq, N, E)
        return o @ wo.T + bo

    q = tgt + query_pos
    x = ln(tgt + mha(q, q, tgt, p["sa_wq"], p["sa_wk"], p["sa_wv"],
                     p["sa_bq"], p["sa_bk"], p["sa_bv"], p["sa_wo"], p["sa_bo"]),
           p["g1"], p["be1"])
    x = ln(x + mha(x + query_pos, memory + pos, memory,
                   p["ca_wq"], p["ca_wk"], p["ca_wv"],
                   p["ca_bq"], p["ca_bk"], p["ca_bv"], p["ca_wo"], p["ca_bo"]),
           p["g2"], p["be2"])
    h = jnp.maximum(x @ p["w1"].T + p["b1"], 0.0)
    x = ln(x + h @ p["w2"].T + p["b2"], p["g3"], p["be3"])
    return x


# ---------------------------------------------------------------------------
# Main
# ---------------------------------------------------------------------------
if __name__ == "__main__":
    d_model, nhead, dim_ff = 32, 4, 64
    L, S, N = 8, 16, 2  # tgt seq, memory seq, batch

    key = jax.random.PRNGKey(0)
    keys = jax.random.split(key, 24)
    ki = iter(keys)

    def w(shape, scale=0.1):
        return jax.random.normal(next(ki), shape, jnp.float32) * scale

    params = {
        # self attention
        "sa_wq": w((d_model, d_model)), "sa_wk": w((d_model, d_model)),
        "sa_wv": w((d_model, d_model)),
        "sa_bq": w((1, d_model)), "sa_bk": w((1, d_model)), "sa_bv": w((1, d_model)),
        "sa_wo": w((d_model, d_model)), "sa_bo": w((1, d_model)),
        # cross attention
        "ca_wq": w((d_model, d_model)), "ca_wk": w((d_model, d_model)),
        "ca_wv": w((d_model, d_model)),
        "ca_bq": w((1, d_model)), "ca_bk": w((1, d_model)), "ca_bv": w((1, d_model)),
        "ca_wo": w((d_model, d_model)), "ca_bo": w((1, d_model)),
        # FFN
        "w1": w((dim_ff, d_model)), "b1": w((1, dim_ff)),
        "w2": w((d_model, dim_ff)), "b2": w((1, d_model)),
        # layernorms (gamma=1, beta=0, as nn.LayerNorm default init)
        "g1": jnp.ones((1, d_model), jnp.float32), "be1": jnp.zeros((1, d_model), jnp.float32),
        "g2": jnp.ones((1, d_model), jnp.float32), "be2": jnp.zeros((1, d_model), jnp.float32),
        "g3": jnp.ones((1, d_model), jnp.float32), "be3": jnp.zeros((1, d_model), jnp.float32),
    }

    data_key = jax.random.split(key, 5)
    tgt = jax.random.normal(data_key[0], (L, N, d_model), jnp.float32)
    memory = jax.random.normal(data_key[1], (S, N, d_model), jnp.float32)
    query_pos = jax.random.normal(data_key[2], (L, N, d_model), jnp.float32)
    pos = jax.random.normal(data_key[3], (S, N, d_model), jnp.float32)

    ref = _ref_layer(tgt, memory, params, query_pos, pos, nhead)

    # f32 MXU operands: tightest reference match (tolerance covers the EUP
    # approximate reciprocal used for the softmax denominator).
    prep_f32 = prepare_params(params, nhead=nhead, mxu_dtype=jnp.float32)
    out = transformer_decoder_layer(tgt, memory, query_pos, pos, prep_f32,
                                    nhead=nhead)
    out = jax.block_until_ready(out)
    assert out.shape == (L, N, d_model)
    err = float(jnp.max(jnp.abs(out - ref)))
    assert jnp.allclose(out, ref, atol=5e-3, rtol=5e-3), f"f32 max abs err = {err}"

    # Default path: bf16 MXU operands (f32 accumulation), recommended on all
    # TPU generations; looser tolerance.
    prep_bf16 = prepare_params(params, nhead=nhead)   # mxu_dtype defaults bf16
    out_bf16 = transformer_decoder_layer(tgt, memory, query_pos, pos, prep_bf16,
                                         nhead=nhead)
    out_bf16 = jax.block_until_ready(out_bf16)
    err_b = float(jnp.max(jnp.abs(out_bf16 - ref)))
    assert jnp.allclose(out_bf16, ref, atol=1e-1, rtol=1e-1), f"bf16 max abs err = {err_b}"

    print("KERNEL_OK")
</pallas_src>

<mosaic_0001>
module attributes {stable_mosaic.version = 11 : i64} {
  func.func @_decoder_layer_kernel(%arg0: i32, %arg1: memref<1x8x32xf32, #tpu.memory_space<vmem>>, %arg2: memref<1x8x32xf32, #tpu.memory_space<vmem>>, %arg3: memref<1x16x32xf32, #tpu.memory_space<vmem>>, %arg4: memref<1x16x32xf32, #tpu.memory_space<vmem>>, %arg5: memref<32x64xf32, #tpu.memory_space<vmem>>, %arg6: memref<1x64xf32, #tpu.memory_space<vmem>>, %arg7: memref<32x32xf32, #tpu.memory_space<vmem>>, %arg8: memref<1x32xf32, #tpu.memory_space<vmem>>, %arg9: memref<32x32xf32, #tpu.memory_space<vmem>>, %arg10: memref<1x32xf32, #tpu.memory_space<vmem>>, %arg11: memref<32x32xf32, #tpu.memory_space<vmem>>, %arg12: memref<1x32xf32, #tpu.memory_space<vmem>>, %arg13: memref<32x32xf32, #tpu.memory_space<vmem>>, %arg14: memref<1x32xf32, #tpu.memory_space<vmem>>, %arg15: memref<32x32xf32, #tpu.memory_space<vmem>>, %arg16: memref<1x32xf32, #tpu.memory_space<vmem>>, %arg17: memref<32x32xf32, #tpu.memory_space<vmem>>, %arg18: memref<1x32xf32, #tpu.memory_space<vmem>>, %arg19: memref<32x64xf32, #tpu.memory_space<vmem>>, %arg20: memref<1x64xf32, #tpu.memory_space<vmem>>, %arg21: memref<64x32xf32, #tpu.memory_space<vmem>>, %arg22: memref<1x32xf32, #tpu.memory_space<vmem>>, %arg23: memref<1x32xf32, #tpu.memory_space<vmem>>, %arg24: memref<1x32xf32, #tpu.memory_space<vmem>>, %arg25: memref<1x32xf32, #tpu.memory_space<vmem>>, %arg26: memref<1x32xf32, #tpu.memory_space<vmem>>, %arg27: memref<1x32xf32, #tpu.memory_space<vmem>>, %arg28: memref<1x32xf32, #tpu.memory_space<vmem>>, %arg29: memref<1x8x32xf32, #tpu.memory_space<vmem>>) attributes {dimension_semantics = [#tpu.dimension_semantics<parallel>], iteration_bounds = array<i64: 2>, scalar_prefetch = 0 : i64, scratch_operands = 0 : i64, tpu.core_type = #tpu.core_type<tc>, window_params = [{transform_indices = @transform_0, window_bounds = array<i64: 1, 8, 32>}, {transform_indices = @transform_1, window_bounds = array<i64: 1, 8, 32>}, {transform_indices = @transform_2, window_bounds = array<i64: 1, 16, 32>}, {transform_indices = @transform_3, window_bounds = array<i64: 1, 16, 32>}, {pipeline_mode = #tpu.pipeline_mode<synchronous>, transform_indices = @transform_4, window_bounds = array<i64: 32, 64>}, {pipeline_mode = #tpu.pipeline_mode<synchronous>, transform_indices = @transform_5, window_bounds = array<i64: 1, 64>}, {pipeline_mode = #tpu.pipeline_mode<synchronous>, transform_indices = @transform_6, window_bounds = array<i64: 32, 32>}, {pipeline_mode = #tpu.pipeline_mode<synchronous>, transform_indices = @transform_7, window_bounds = array<i64: 1, 32>}, {pipeline_mode = #tpu.pipeline_mode<synchronous>, transform_indices = @transform_8, window_bounds = array<i64: 32, 32>}, {pipeline_mode = #tpu.pipeline_mode<synchronous>, transform_indices = @transform_9, window_bounds = array<i64: 1, 32>}, {pipeline_mode = #tpu.pipeline_mode<synchronous>, transform_indices = @transform_10, window_bounds = array<i64: 32, 32>}, {pipeline_mode = #tpu.pipeline_mode<synchronous>, transform_indices = @transform_11, window_bounds = array<i64: 1, 32>}, {pipeline_mode = #tpu.pipeline_mode<synchronous>, transform_indices = @transform_12, window_bounds = array<i64: 32, 32>}, {pipeline_mode = #tpu.pipeline_mode<synchronous>, transform_indices = @transform_13, window_bounds = array<i64: 1, 32>}, {pipeline_mode = #tpu.pipeline_mode<synchronous>, transform_indices = @transform_14, window_bounds = array<i64: 32, 32>}, {pipeline_mode = #tpu.pipeline_mode<synchronous>, transform_indices = @transform_15, window_bounds = array<i64: 1, 32>}, {pipeline_mode = #tpu.pipeline_mode<synchronous>, transform_indices = @transform_16, window_bounds = array<i64: 32, 32>}, {pipeline_mode = #tpu.pipeline_mode<synchronous>, transform_indices = @transform_17, window_bounds = array<i64: 1, 32>}, {pipeline_mode = #tpu.pipeline_mode<synchronous>, transform_indices = @transform_18, window_bounds = array<i64: 32, 64>}, {pipeline_mode = #tpu.pipeline_mode<synchronous>, transform_indices = @transform_19, window_bounds = array<i64: 1, 64>}, {pipeline_mode = #tpu.pipeline_mode<synchronous>, transform_indices = @transform_20, window_bounds = array<i64: 64, 32>}, {pipeline_mode = #tpu.pipeline_mode<synchronous>, transform_indices = @transform_21, window_bounds = array<i64: 1, 32>}, {pipeline_mode = #tpu.pipeline_mode<synchronous>, transform_indices = @transform_22, window_bounds = array<i64: 1, 32>}, {pipeline_mode = #tpu.pipeline_mode<synchronous>, transform_indices = @transform_23, window_bounds = array<i64: 1, 32>}, {pipeline_mode = #tpu.pipeline_mode<synchronous>, transform_indices = @transform_24, window_bounds = array<i64: 1, 32>}, {pipeline_mode = #tpu.pipeline_mode<synchronous>, transform_indices = @transform_25, window_bounds = array<i64: 1, 32>}, {pipeline_mode = #tpu.pipeline_mode<synchronous>, transform_indices = @transform_26, window_bounds = array<i64: 1, 32>}, {pipeline_mode = #tpu.pipeline_mode<synchronous>, transform_indices = @transform_27, window_bounds = array<i64: 1, 32>}, {transform_indices = @transform_28, window_bounds = array<i64: 1, 8, 32>}]} {
    %c0 = arith.constant 0 : index
    %c0_0 = arith.constant 0 : index
    %c0_1 = arith.constant 0 : index
    %0 = vector.load %arg1[%c0, %c0_0, %c0_1] : memref<1x8x32xf32, #tpu.memory_space<vmem>>, vector<1x8x32xf32>
    %1 = vector.shape_cast %0 : vector<1x8x32xf32> to vector<8x32xf32>
    %c0_2 = arith.constant 0 : index
    %c0_3 = arith.constant 0 : index
    %c0_4 = arith.constant 0 : index
    %2 = vector.load %arg2[%c0_2, %c0_3, %c0_4] : memref<1x8x32xf32, #tpu.memory_space<vmem>>, vector<1x8x32xf32>
    %3 = vector.shape_cast %2 : vector<1x8x32xf32> to vector<8x32xf32>
    %c0_5 = arith.constant 0 : index
    %c0_6 = arith.constant 0 : index
    %c0_7 = arith.constant 0 : index
    %4 = vector.load %arg3[%c0_5, %c0_6, %c0_7] : memref<1x16x32xf32, #tpu.memory_space<vmem>>, vector<1x16x32xf32>
    %5 = vector.shape_cast %4 : vector<1x16x32xf32> to vector<16x32xf32>
    %c0_8 = arith.constant 0 : index
    %c0_9 = arith.constant 0 : index
    %c0_10 = arith.constant 0 : index
    %6 = vector.load %arg4[%c0_8, %c0_9, %c0_10] : memref<1x16x32xf32, #tpu.memory_space<vmem>>, vector<1x16x32xf32>
    %7 = vector.shape_cast %6 : vector<1x16x32xf32> to vector<16x32xf32>
    %8 = arith.addf %1, %3 : vector<8x32xf32>
    %c0_11 = arith.constant 0 : index
    %c0_12 = arith.constant 0 : index
    %9 = vector.load %arg5[%c0_11, %c0_12] : memref<32x64xf32, #tpu.memory_space<vmem>>, vector<32x64xf32>
    %c0_13 = arith.constant 0 : index
    %c0_14 = arith.constant 0 : index
    %10 = vector.load %arg6[%c0_13, %c0_14] : memref<1x64xf32, #tpu.memory_space<vmem>>, vector<1x64xf32>
    %cst = arith.constant dense<0.000000e+00> : vector<8x64xf32>
    %11 = tpu.matmul %8, %9, %cst {dimension_numbers = #tpu.dot_dimension_numbers<[1], [0], [0], [1], [0, 0, 1, 1], [], []>} : vector<8x32xf32>, vector<32x64xf32>, vector<8x64xf32> -> vector<8x64xf32>
    %12 = vector.broadcast %10 : vector<1x64xf32> to vector<8x64xf32>
    %13 = arith.addf %11, %12 : vector<8x64xf32>
    %c0_15 = arith.constant 0 : index
    %c0_16 = arith.constant 0 : index
    %14 = vector.load %arg7[%c0_15, %c0_16] : memref<32x32xf32, #tpu.memory_space<vmem>>, vector<32x32xf32>
    %c0_17 = arith.constant 0 : index
    %c0_18 = arith.constant 0 : index
    %15 = vector.load %arg8[%c0_17, %c0_18] : memref<1x32xf32, #tpu.memory_space<vmem>>, vector<1x32xf32>
    %cst_19 = arith.constant dense<0.000000e+00> : vector<8x32xf32>
    %16 = tpu.matmul %1, %14, %cst_19 {dimension_numbers = #tpu.dot_dimension_numbers<[1], [0], [0], [1], [0, 0, 1, 1], [], []>} : vector<8x32xf32>, vector<32x32xf32>, vector<8x32xf32> -> vector<8x32xf32>
    %17 = vector.broadcast %15 : vector<1x32xf32> to vector<8x32xf32>
    %18 = arith.addf %16, %17 : vector<8x32xf32>
    %19 = vector.extract_strided_slice %13 {offsets = [0, 0], sizes = [8, 32], strides = [1, 1]} : vector<8x64xf32> to vector<8x32xf32>
    %20 = vector.extract_strided_slice %13 {offsets = [0, 32], sizes = [8, 32], strides = [1, 1]} : vector<8x64xf32> to vector<8x32xf32>
    %c0_20 = arith.constant 0 : index
    %c0_21 = arith.constant 0 : index
    %21 = vector.load %arg9[%c0_20, %c0_21] : memref<32x32xf32, #tpu.memory_space<vmem>>, vector<32x32xf32>
    %c0_22 = arith.constant 0 : index
    %c0_23 = arith.constant 0 : index
    %22 = vector.load %arg10[%c0_22, %c0_23] : memref<1x32xf32, #tpu.memory_space<vmem>>, vector<1x32xf32>
    %23 = vector.extract_strided_slice %19 {offsets = [0, 0], sizes = [8, 8], strides = [1, 1]} : vector<8x32xf32> to vector<8x8xf32>
    %24 = vector.extract_strided_slice %19 {offsets = [0, 8], sizes = [8, 8], strides = [1, 1]} : vector<8x32xf32> to vector<8x8xf32>
    %25 = vector.extract_strided_slice %19 {offsets = [0, 16], sizes = [8, 8], strides = [1, 1]} : vector<8x32xf32> to vector<8x8xf32>
    %26 = vector.extract_strided_slice %19 {offsets = [0, 24], sizes = [8, 8], strides = [1, 1]} : vector<8x32xf32> to vector<8x8xf32>
    %27 = vector.shape_cast %23 : vector<8x8xf32> to vector<1x8x8xf32>
    %28 = vector.shape_cast %24 : vector<8x8xf32> to vector<1x8x8xf32>
    %29 = vector.shape_cast %25 : vector<8x8xf32> to vector<1x8x8xf32>
    %30 = vector.shape_cast %26 : vector<8x8xf32> to vector<1x8x8xf32>
    %31 = tpu.concatenate %27, %28, %29, %30 in 0 : vector<1x8x8xf32>, vector<1x8x8xf32>, vector<1x8x8xf32>, vector<1x8x8xf32> -> vector<4x8x8xf32>
    %32 = vector.extract_strided_slice %20 {offsets = [0, 0], sizes = [8, 8], strides = [1, 1]} : vector<8x32xf32> to vector<8x8xf32>
    %33 = vector.extract_strided_slice %20 {offsets = [0, 8], sizes = [8, 8], strides = [1, 1]} : vector<8x32xf32> to vector<8x8xf32>
    %34 = vector.extract_strided_slice %20 {offsets = [0, 16], sizes = [8, 8], strides = [1, 1]} : vector<8x32xf32> to vector<8x8xf32>
    %35 = vector.extract_strided_slice %20 {offsets = [0, 24], sizes = [8, 8], strides = [1, 1]} : vector<8x32xf32> to vector<8x8xf32>
    %36 = vector.shape_cast %32 : vector<8x8xf32> to vector<1x8x8xf32>
    %37 = vector.shape_cast %33 : vector<8x8xf32> to vector<1x8x8xf32>
    %38 = vector.shape_cast %34 : vector<8x8xf32> to vector<1x8x8xf32>
    %39 = vector.shape_cast %35 : vector<8x8xf32> to vector<1x8x8xf32>
    %40 = tpu.concatenate %36, %37, %38, %39 in 0 : vector<1x8x8xf32>, vector<1x8x8xf32>, vector<1x8x8xf32>, vector<1x8x8xf32> -> vector<4x8x8xf32>
    %41 = vector.extract_strided_slice %18 {offsets = [0, 0], sizes = [8, 8], strides = [1, 1]} : vector<8x32xf32> to vector<8x8xf32>
    %42 = vector.extract_strided_slice %18 {offsets = [0, 8], sizes = [8, 8], strides = [1, 1]} : vector<8x32xf32> to vector<8x8xf32>
    %43 = vector.extract_strided_slice %18 {offsets = [0, 16], sizes = [8, 8], strides = [1, 1]} : vector<8x32xf32> to vector<8x8xf32>
    %44 = vector.extract_strided_slice %18 {offsets = [0, 24], sizes = [8, 8], strides = [1, 1]} : vector<8x32xf32> to vector<8x8xf32>
    %45 = vector.shape_cast %41 : vector<8x8xf32> to vector<1x8x8xf32>
    %46 = vector.shape_cast %42 : vector<8x8xf32> to vector<1x8x8xf32>
    %47 = vector.shape_cast %43 : vector<8x8xf32> to vector<1x8x8xf32>
    %48 = vector.shape_cast %44 : vector<8x8xf32> to vector<1x8x8xf32>
    %49 = tpu.concatenate %45, %46, %47, %48 in 0 : vector<1x8x8xf32>, vector<1x8x8xf32>, vector<1x8x8xf32>, vector<1x8x8xf32> -> vector<4x8x8xf32>
    "tpu.trace_start"() <{level = 10 : i32, message = "hqd,hkd->hqk"}> : () -> ()
    %cst_24 = arith.constant dense<0.000000e+00> : vector<4x8x8xf32>
    %50 = tpu.matmul %31, %40, %cst_24 {dimension_numbers = #tpu.dot_dimension_numbers<[2], [2], [1], [1], [0, 0, 0, 1, 1, 1], [0], [0]>} : vector<4x8x8xf32>, vector<4x8x8xf32>, vector<4x8x8xf32> -> vector<4x8x8xf32>
    "tpu.trace_stop"() : () -> ()
    %cst_25 = arith.constant dense<0xFF800000> : vector<4x8xf32>
    %51 = vector.multi_reduction <maximumf>, %50, %cst_25 [2] : vector<4x8x8xf32> to vector<4x8xf32>
    %52 = vector.shape_cast %51 : vector<4x8xf32> to vector<4x8x1xf32>
    %53 = vector.broadcast %52 : vector<4x8x1xf32> to vector<4x8x8xf32>
    %54 = arith.subf %50, %53 : vector<4x8x8xf32>
    %55 = math.exp %54 : vector<4x8x8xf32>
    %cst_26 = arith.constant dense<0.000000e+00> : vector<4x8xf32>
    %56 = vector.multi_reduction <add>, %55, %cst_26 [2] : vector<4x8x8xf32> to vector<4x8xf32>
    %57 = vector.shape_cast %56 : vector<4x8xf32> to vector<4x8x1xf32>
    %58 = tpu.reciprocal %57 {approx = true} : vector<4x8x1xf32> -> vector<4x8x1xf32>
    %59 = vector.broadcast %58 : vector<4x8x1xf32> to vector<4x8x8xf32>
    %60 = arith.mulf %55, %59 : vector<4x8x8xf32>
    "tpu.trace_start"() <{level = 10 : i32, message = "hqk,hkd->hqd"}> : () -> ()
    %cst_27 = arith.constant dense<0.000000e+00> : vector<4x8x8xf32>
    %61 = tpu.matmul %60, %49, %cst_27 {dimension_numbers = #tpu.dot_dimension_numbers<[2], [1], [1], [2], [0, 0, 0, 1, 1, 2], [0], [0]>} : vector<4x8x8xf32>, vector<4x8x8xf32>, vector<4x8x8xf32> -> vector<4x8x8xf32>
    "tpu.trace_stop"() : () -> ()
    %62 = vector.extract_strided_slice %61 {offsets = [0, 0, 0], sizes = [1, 8, 8], strides = [1, 1, 1]} : vector<4x8x8xf32> to vector<1x8x8xf32>
    %63 = vector.shape_cast %62 : vector<1x8x8xf32> to vector<8x8xf32>
    %64 = vector.extract_strided_slice %61 {offsets = [1, 0, 0], sizes = [1, 8, 8], strides = [1, 1, 1]} : vector<4x8x8xf32> to vector<1x8x8xf32>
    %65 = vector.shape_cast %64 : vector<1x8x8xf32> to vector<8x8xf32>
    %66 = vector.extract_strided_slice %61 {offsets = [2, 0, 0], sizes = [1, 8, 8], strides = [1, 1, 1]} : vector<4x8x8xf32> to vector<1x8x8xf32>
    %67 = vector.shape_cast %66 : vector<1x8x8xf32> to vector<8x8xf32>
    %68 = vector.extract_strided_slice %61 {offsets = [3, 0, 0], sizes = [1, 8, 8], strides = [1, 1, 1]} : vector<4x8x8xf32> to vector<1x8x8xf32>
    %69 = vector.shape_cast %68 : vector<1x8x8xf32> to vector<8x8xf32>
    %70 = tpu.concatenate %63, %65, %67, %69 in 1 : vector<8x8xf32>, vector<8x8xf32>, vector<8x8xf32>, vector<8x8xf32> -> vector<8x32xf32>
    %cst_28 = arith.constant dense<0.000000e+00> : vector<8x32xf32>
    %71 = tpu.matmul %70, %21, %cst_28 {dimension_numbers = #tpu.dot_dimension_numbers<[1], [0], [0], [1], [0, 0, 1, 1], [], []>} : vector<8x32xf32>, vector<32x32xf32>, vector<8x32xf32> -> vector<8x32xf32>
    %72 = vector.broadcast %22 : vector<1x32xf32> to vector<8x32xf32>
    %73 = arith.addf %71, %72 : vector<8x32xf32>
    %74 = arith.addf %1, %73 : vector<8x32xf32>
    %c0_29 = arith.constant 0 : index
    %c0_30 = arith.constant 0 : index
    %75 = vector.load %arg23[%c0_29, %c0_30] : memref<1x32xf32, #tpu.memory_space<vmem>>, vector<1x32xf32>
    %c0_31 = arith.constant 0 : index
    %c0_32 = arith.constant 0 : index
    %76 = vector.load %arg24[%c0_31, %c0_32] : memref<1x32xf32, #tpu.memory_space<vmem>>, vector<1x32xf32>
    %cst_33 = arith.constant dense<0.000000e+00> : vector<8xf32>
    %77 = vector.multi_reduction <add>, %74, %cst_33 [1] : vector<8x32xf32> to vector<8xf32>
    %78 = vector.shape_cast %77 : vector<8xf32> to vector<8x1xf32>
    %cst_34 = arith.constant 3.200000e+01 : f32
    %79 = vector.broadcast %cst_34 : f32 to vector<8x1xf32>
    %80 = arith.divf %78, %79 : vector<8x1xf32>
    %81 = arith.mulf %74, %74 : vector<8x32xf32>
    %cst_35 = arith.constant dense<0.000000e+00> : vector<8xf32>
    %82 = vector.multi_reduction <add>, %81, %cst_35 [1] : vector<8x32xf32> to vector<8xf32>
    %83 = vector.shape_cast %82 : vector<8xf32> to vector<8x1xf32>
    %cst_36 = arith.constant 3.200000e+01 : f32
    %84 = vector.broadcast %cst_36 : f32 to vector<8x1xf32>
    %85 = arith.divf %83, %84 : vector<8x1xf32>
    %86 = arith.mulf %80, %80 : vector<8x1xf32>
    %87 = arith.subf %85, %86 : vector<8x1xf32>
    %88 = vector.broadcast %80 : vector<8x1xf32> to vector<8x32xf32>
    %89 = arith.subf %74, %88 : vector<8x32xf32>
    %cst_37 = arith.constant 9.99999974E-6 : f32
    %90 = vector.broadcast %cst_37 : f32 to vector<8x1xf32>
    %91 = arith.addf %87, %90 : vector<8x1xf32>
    %92 = math.rsqrt %91 : vector<8x1xf32>
    %93 = vector.broadcast %92 : vector<8x1xf32> to vector<8x32xf32>
    %94 = arith.mulf %89, %93 : vector<8x32xf32>
    %95 = vector.broadcast %75 : vector<1x32xf32> to vector<8x32xf32>
    %96 = arith.mulf %94, %95 : vector<8x32xf32>
    %97 = vector.broadcast %76 : vector<1x32xf32> to vector<8x32xf32>
    %98 = arith.addf %96, %97 : vector<8x32xf32>
    %99 = arith.addf %98, %3 : vector<8x32xf32>
    %c0_38 = arith.constant 0 : index
    %c0_39 = arith.constant 0 : index
    %100 = vector.load %arg11[%c0_38, %c0_39] : memref<32x32xf32, #tpu.memory_space<vmem>>, vector<32x32xf32>
    %c0_40 = arith.constant 0 : index
    %c0_41 = arith.constant 0 : index
    %101 = vector.load %arg12[%c0_40, %c0_41] : memref<1x32xf32, #tpu.memory_space<vmem>>, vector<1x32xf32>
    %cst_42 = arith.constant dense<0.000000e+00> : vector<8x32xf32>
    %102 = tpu.matmul %99, %100, %cst_42 {dimension_numbers = #tpu.dot_dimension_numbers<[1], [0], [0], [1], [0, 0, 1, 1], [], []>} : vector<8x32xf32>, vector<32x32xf32>, vector<8x32xf32> -> vector<8x32xf32>
    %103 = vector.broadcast %101 : vector<1x32xf32> to vector<8x32xf32>
    %104 = arith.addf %102, %103 : vector<8x32xf32>
    %105 = arith.addf %5, %7 : vector<16x32xf32>
    %c0_43 = arith.constant 0 : index
    %c0_44 = arith.constant 0 : index
    %106 = vector.load %arg13[%c0_43, %c0_44] : memref<32x32xf32, #tpu.memory_space<vmem>>, vector<32x32xf32>
    %c0_45 = arith.constant 0 : index
    %c0_46 = arith.constant 0 : index
    %107 = vector.load %arg14[%c0_45, %c0_46] : memref<1x32xf32, #tpu.memory_space<vmem>>, vector<1x32xf32>
    %cst_47 = arith.constant dense<0.000000e+00> : vector<16x32xf32>
    %108 = tpu.matmul %105, %106, %cst_47 {dimension_numbers = #tpu.dot_dimension_numbers<[1], [0], [0], [1], [0, 0, 1, 1], [], []>} : vector<16x32xf32>, vector<32x32xf32>, vector<16x32xf32> -> vector<16x32xf32>
    %109 = vector.broadcast %107 : vector<1x32xf32> to vector<16x32xf32>
    %110 = arith.addf %108, %109 : vector<16x32xf32>
    %c0_48 = arith.constant 0 : index
    %c0_49 = arith.constant 0 : index
    %111 = vector.load %arg15[%c0_48, %c0_49] : memref<32x32xf32, #tpu.memory_space<vmem>>, vector<32x32xf32>
    %c0_50 = arith.constant 0 : index
    %c0_51 = arith.constant 0 : index
    %112 = vector.load %arg16[%c0_50, %c0_51] : memref<1x32xf32, #tpu.memory_space<vmem>>, vector<1x32xf32>
    %cst_52 = arith.constant dense<0.000000e+00> : vector<16x32xf32>
    %113 = tpu.matmul %5, %111, %cst_52 {dimension_numbers = #tpu.dot_dimension_numbers<[1], [0], [0], [1], [0, 0, 1, 1], [], []>} : vector<16x32xf32>, vector<32x32xf32>, vector<16x32xf32> -> vector<16x32xf32>
    %114 = vector.broadcast %112 : vector<1x32xf32> to vector<16x32xf32>
    %115 = arith.addf %113, %114 : vector<16x32xf32>
    %c0_53 = arith.constant 0 : index
    %c0_54 = arith.constant 0 : index
    %116 = vector.load %arg17[%c0_53, %c0_54] : memref<32x32xf32, #tpu.memory_space<vmem>>, vector<32x32xf32>
    %c0_55 = arith.constant 0 : index
    %c0_56 = arith.constant 0 : index
    %117 = vector.load %arg18[%c0_55, %c0_56] : memref<1x32xf32, #tpu.memory_space<vmem>>, vector<1x32xf32>
    %118 = vector.extract_strided_slice %104 {offsets = [0, 0], sizes = [8, 8], strides = [1, 1]} : vector<8x32xf32> to vector<8x8xf32>
    %119 = vector.extract_strided_slice %104 {offsets = [0, 8], sizes = [8, 8], strides = [1, 1]} : vector<8x32xf32> to vector<8x8xf32>
    %120 = vector.extract_strided_slice %104 {offsets = [0, 16], sizes = [8, 8], strides = [1, 1]} : vector<8x32xf32> to vector<8x8xf32>
    %121 = vector.extract_strided_slice %104 {offsets = [0, 24], sizes = [8, 8], strides = [1, 1]} : vector<8x32xf32> to vector<8x8xf32>
    %122 = vector.shape_cast %118 : vector<8x8xf32> to vector<1x8x8xf32>
    %123 = vector.shape_cast %119 : vector<8x8xf32> to vector<1x8x8xf32>
    %124 = vector.shape_cast %120 : vector<8x8xf32> to vector<1x8x8xf32>
    %125 = vector.shape_cast %121 : vector<8x8xf32> to vector<1x8x8xf32>
    %126 = tpu.concatenate %122, %123, %124, %125 in 0 : vector<1x8x8xf32>, vector<1x8x8xf32>, vector<1x8x8xf32>, vector<1x8x8xf32> -> vector<4x8x8xf32>
    %127 = vector.extract_strided_slice %110 {offsets = [0, 0], sizes = [16, 8], strides = [1, 1]} : vector<16x32xf32> to vector<16x8xf32>
    %128 = vector.extract_strided_slice %110 {offsets = [0, 8], sizes = [16, 8], strides = [1, 1]} : vector<16x32xf32> to vector<16x8xf32>
    %129 = vector.extract_strided_slice %110 {offsets = [0, 16], sizes = [16, 8], strides = [1, 1]} : vector<16x32xf32> to vector<16x8xf32>
    %130 = vector.extract_strided_slice %110 {offsets = [0, 24], sizes = [16, 8], strides = [1, 1]} : vector<16x32xf32> to vector<16x8xf32>
    %131 = vector.shape_cast %127 : vector<16x8xf32> to vector<1x16x8xf32>
    %132 = vector.shape_cast %128 : vector<16x8xf32> to vector<1x16x8xf32>
    %133 = vector.shape_cast %129 : vector<16x8xf32> to vector<1x16x8xf32>
    %134 = vector.shape_cast %130 : vector<16x8xf32> to vector<1x16x8xf32>
    %135 = tpu.concatenate %131, %132, %133, %134 in 0 : vector<1x16x8xf32>, vector<1x16x8xf32>, vector<1x16x8xf32>, vector<1x16x8xf32> -> vector<4x16x8xf32>
    %136 = vector.extract_strided_slice %115 {offsets = [0, 0], sizes = [16, 8], strides = [1, 1]} : vector<16x32xf32> to vector<16x8xf32>
    %137 = vector.extract_strided_slice %115 {offsets = [0, 8], sizes = [16, 8], strides = [1, 1]} : vector<16x32xf32> to vector<16x8xf32>
    %138 = vector.extract_strided_slice %115 {offsets = [0, 16], sizes = [16, 8], strides = [1, 1]} : vector<16x32xf32> to vector<16x8xf32>
    %139 = vector.extract_strided_slice %115 {offsets = [0, 24], sizes = [16, 8], strides = [1, 1]} : vector<16x32xf32> to vector<16x8xf32>
    %140 = vector.shape_cast %136 : vector<16x8xf32> to vector<1x16x8xf32>
    %141 = vector.shape_cast %137 : vector<16x8xf32> to vector<1x16x8xf32>
    %142 = vector.shape_cast %138 : vector<16x8xf32> to vector<1x16x8xf32>
    %143 = vector.shape_cast %139 : vector<16x8xf32> to vector<1x16x8xf32>
    %144 = tpu.concatenate %140, %141, %142, %143 in 0 : vector<1x16x8xf32>, vector<1x16x8xf32>, vector<1x16x8xf32>, vector<1x16x8xf32> -> vector<4x16x8xf32>
    "tpu.trace_start"() <{level = 10 : i32, message = "hqd,hkd->hqk"}> : () -> ()
    %cst_57 = arith.constant dense<0.000000e+00> : vector<4x8x16xf32>
    %145 = tpu.matmul %126, %135, %cst_57 {dimension_numbers = #tpu.dot_dimension_numbers<[2], [2], [1], [1], [0, 0, 0, 1, 1, 1], [0], [0]>} : vector<4x8x8xf32>, vector<4x16x8xf32>, vector<4x8x16xf32> -> vector<4x8x16xf32>
    "tpu.trace_stop"() : () -> ()
    %cst_58 = arith.constant dense<0xFF800000> : vector<4x8xf32>
    %146 = vector.multi_reduction <maximumf>, %145, %cst_58 [2] : vector<4x8x16xf32> to vector<4x8xf32>
    %147 = vector.shape_cast %146 : vector<4x8xf32> to vector<4x8x1xf32>
    %148 = vector.broadcast %147 : vector<4x8x1xf32> to vector<4x8x16xf32>
    %149 = arith.subf %145, %148 : vector<4x8x16xf32>
    %150 = math.exp %149 : vector<4x8x16xf32>
    %cst_59 = arith.constant dense<0.000000e+00> : vector<4x8xf32>
    %151 = vector.multi_reduction <add>, %150, %cst_59 [2] : vector<4x8x16xf32> to vector<4x8xf32>
    %152 = vector.shape_cast %151 : vector<4x8xf32> to vector<4x8x1xf32>
    %153 = tpu.reciprocal %152 {approx = true} : vector<4x8x1xf32> -> vector<4x8x1xf32>
    %154 = vector.broadcast %153 : vector<4x8x1xf32> to vector<4x8x16xf32>
    %155 = arith.mulf %150, %154 : vector<4x8x16xf32>
    "tpu.trace_start"() <{level = 10 : i32, message = "hqk,hkd->hqd"}> : () -> ()
    %cst_60 = arith.constant dense<0.000000e+00> : vector<4x8x8xf32>
    %156 = tpu.matmul %155, %144, %cst_60 {dimension_numbers = #tpu.dot_dimension_numbers<[2], [1], [1], [2], [0, 0, 0, 1, 1, 2], [0], [0]>} : vector<4x8x16xf32>, vector<4x16x8xf32>, vector<4x8x8xf32> -> vector<4x8x8xf32>
    "tpu.trace_stop"() : () -> ()
    %157 = vector.extract_strided_slice %156 {offsets = [0, 0, 0], sizes = [1, 8, 8], strides = [1, 1, 1]} : vector<4x8x8xf32> to vector<1x8x8xf32>
    %158 = vector.shape_cast %157 : vector<1x8x8xf32> to vector<8x8xf32>
    %159 = vector.extract_strided_slice %156 {offsets = [1, 0, 0], sizes = [1, 8, 8], strides = [1, 1, 1]} : vector<4x8x8xf32> to vector<1x8x8xf32>
    %160 = vector.shape_cast %159 : vector<1x8x8xf32> to vector<8x8xf32>
    %161 = vector.extract_strided_slice %156 {offsets = [2, 0, 0], sizes = [1, 8, 8], strides = [1, 1, 1]} : vector<4x8x8xf32> to vector<1x8x8xf32>
    %162 = vector.shape_cast %161 : vector<1x8x8xf32> to vector<8x8xf32>
    %163 = vector.extract_strided_slice %156 {offsets = [3, 0, 0], sizes = [1, 8, 8], strides = [1, 1, 1]} : vector<4x8x8xf32> to vector<1x8x8xf32>
    %164 = vector.shape_cast %163 : vector<1x8x8xf32> to vector<8x8xf32>
    %165 = tpu.concatenate %158, %160, %162, %164 in 1 : vector<8x8xf32>, vector<8x8xf32>, vector<8x8xf32>, vector<8x8xf32> -> vector<8x32xf32>
    %cst_61 = arith.constant dense<0.000000e+00> : vector<8x32xf32>
    %166 = tpu.matmul %165, %116, %cst_61 {dimension_numbers = #tpu.dot_dimension_numbers<[1], [0], [0], [1], [0, 0, 1, 1], [], []>} : vector<8x32xf32>, vector<32x32xf32>, vector<8x32xf32> -> vector<8x32xf32>
    %167 = vector.broadcast %117 : vector<1x32xf32> to vector<8x32xf32>
    %168 = arith.addf %166, %167 : vector<8x32xf32>
    %169 = arith.addf %98, %168 : vector<8x32xf32>
    %c0_62 = arith.constant 0 : index
    %c0_63 = arith.constant 0 : index
    %170 = vector.load %arg25[%c0_62, %c0_63] : memref<1x32xf32, #tpu.memory_space<vmem>>, vector<1x32xf32>
    %c0_64 = arith.constant 0 : index
    %c0_65 = arith.constant 0 : index
    %171 = vector.load %arg26[%c0_64, %c0_65] : memref<1x32xf32, #tpu.memory_space<vmem>>, vector<1x32xf32>
    %cst_66 = arith.constant dense<0.000000e+00> : vector<8xf32>
    %172 = vector.multi_reduction <add>, %169, %cst_66 [1] : vector<8x32xf32> to vector<8xf32>
    %173 = vector.shape_cast %172 : vector<8xf32> to vector<8x1xf32>
    %cst_67 = arith.constant 3.200000e+01 : f32
    %174 = vector.broadcast %cst_67 : f32 to vector<8x1xf32>
    %175 = arith.divf %173, %174 : vector<8x1xf32>
    %176 = arith.mulf %169, %169 : vector<8x32xf32>
    %cst_68 = arith.constant dense<0.000000e+00> : vector<8xf32>
    %177 = vector.multi_reduction <add>, %176, %cst_68 [1] : vector<8x32xf32> to vector<8xf32>
    %178 = vector.shape_cast %177 : vector<8xf32> to vector<8x1xf32>
    %cst_69 = arith.constant 3.200000e+01 : f32
    %179 = vector.broadcast %cst_69 : f32 to vector<8x1xf32>
    %180 = arith.divf %178, %179 : vector<8x1xf32>
    %181 = arith.mulf %175, %175 : vector<8x1xf32>
    %182 = arith.subf %180, %181 : vector<8x1xf32>
    %183 = vector.broadcast %175 : vector<8x1xf32> to vector<8x32xf32>
    %184 = arith.subf %169, %183 : vector<8x32xf32>
    %cst_70 = arith.constant 9.99999974E-6 : f32
    %185 = vector.broadcast %cst_70 : f32 to vector<8x1xf32>
    %186 = arith.addf %182, %185 : vector<8x1xf32>
    %187 = math.rsqrt %186 : vector<8x1xf32>
    %188 = vector.broadcast %187 : vector<8x1xf32> to vector<8x32xf32>
    %189 = arith.mulf %184, %188 : vector<8x32xf32>
    %190 = vector.broadcast %170 : vector<1x32xf32> to vector<8x32xf32>
    %191 = arith.mulf %189, %190 : vector<8x32xf32>
    %192 = vector.broadcast %171 : vector<1x32xf32> to vector<8x32xf32>
    %193 = arith.addf %191, %192 : vector<8x32xf32>
    %c0_71 = arith.constant 0 : index
    %c0_72 = arith.constant 0 : index
    %194 = vector.load %arg19[%c0_71, %c0_72] : memref<32x64xf32, #tpu.memory_space<vmem>>, vector<32x64xf32>
    %c0_73 = arith.constant 0 : index
    %c0_74 = arith.constant 0 : index
    %195 = vector.load %arg20[%c0_73, %c0_74] : memref<1x64xf32, #tpu.memory_space<vmem>>, vector<1x64xf32>
    %cst_75 = arith.constant dense<0.000000e+00> : vector<8x64xf32>
    %196 = tpu.matmul %193, %194, %cst_75 {dimension_numbers = #tpu.dot_dimension_numbers<[1], [0], [0], [1], [0, 0, 1, 1], [], []>} : vector<8x32xf32>, vector<32x64xf32>, vector<8x64xf32> -> vector<8x64xf32>
    %197 = vector.broadcast %195 : vector<1x64xf32> to vector<8x64xf32>
    %198 = arith.addf %196, %197 : vector<8x64xf32>
    %cst_76 = arith.constant 0.000000e+00 : f32
    %199 = vector.broadcast %cst_76 : f32 to vector<8x64xf32>
    %200 = arith.maximumf %198, %199 : vector<8x64xf32>
    %c0_77 = arith.constant 0 : index
    %c0_78 = arith.constant 0 : index
    %201 = vector.load %arg21[%c0_77, %c0_78] : memref<64x32xf32, #tpu.memory_space<vmem>>, vector<64x32xf32>
    %c0_79 = arith.constant 0 : index
    %c0_80 = arith.constant 0 : index
    %202 = vector.load %arg22[%c0_79, %c0_80] : memref<1x32xf32, #tpu.memory_space<vmem>>, vector<1x32xf32>
    %cst_81 = arith.constant dense<0.000000e+00> : vector<8x32xf32>
    %203 = tpu.matmul %200, %201, %cst_81 {dimension_numbers = #tpu.dot_dimension_numbers<[1], [0], [0], [1], [0, 0, 1, 1], [], []>} : vector<8x64xf32>, vector<64x32xf32>, vector<8x32xf32> -> vector<8x32xf32>
    %204 = vector.broadcast %202 : vector<1x32xf32> to vector<8x32xf32>
    %205 = arith.addf %203, %204 : vector<8x32xf32>
    %206 = arith.addf %193, %205 : vector<8x32xf32>
    %c0_82 = arith.constant 0 : index
    %c0_83 = arith.constant 0 : index
    %207 = vector.load %arg27[%c0_82, %c0_83] : memref<1x32xf32, #tpu.memory_space<vmem>>, vector<1x32xf32>
    %c0_84 = arith.constant 0 : index
    %c0_85 = arith.constant 0 : index
    %208 = vector.load %arg28[%c0_84, %c0_85] : memref<1x32xf32, #tpu.memory_space<vmem>>, vector<1x32xf32>
    %cst_86 = arith.constant dense<0.000000e+00> : vector<8xf32>
    %209 = vector.multi_reduction <add>, %206, %cst_86 [1] : vector<8x32xf32> to vector<8xf32>
    %210 = vector.shape_cast %209 : vector<8xf32> to vector<8x1xf32>
    %cst_87 = arith.constant 3.200000e+01 : f32
    %211 = vector.broadcast %cst_87 : f32 to vector<8x1xf32>
    %212 = arith.divf %210, %211 : vector<8x1xf32>
    %213 = arith.mulf %206, %206 : vector<8x32xf32>
    %cst_88 = arith.constant dense<0.000000e+00> : vector<8xf32>
    %214 = vector.multi_reduction <add>, %213, %cst_88 [1] : vector<8x32xf32> to vector<8xf32>
    %215 = vector.shape_cast %214 : vector<8xf32> to vector<8x1xf32>
    %cst_89 = arith.constant 3.200000e+01 : f32
    %216 = vector.broadcast %cst_89 : f32 to vector<8x1xf32>
    %217 = arith.divf %215, %216 : vector<8x1xf32>
    %218 = arith.mulf %212, %212 : vector<8x1xf32>
    %219 = arith.subf %217, %218 : vector<8x1xf32>
    %220 = vector.broadcast %212 : vector<8x1xf32> to vector<8x32xf32>
    %221 = arith.subf %206, %220 : vector<8x32xf32>
    %cst_90 = arith.constant 9.99999974E-6 : f32
    %222 = vector.broadcast %cst_90 : f32 to vector<8x1xf32>
    %223 = arith.addf %219, %222 : vector<8x1xf32>
    %224 = math.rsqrt %223 : vector<8x1xf32>
    %225 = vector.broadcast %224 : vector<8x1xf32> to vector<8x32xf32>
    %226 = arith.mulf %221, %225 : vector<8x32xf32>
    %227 = vector.broadcast %207 : vector<1x32xf32> to vector<8x32xf32>
    %228 = arith.mulf %226, %227 : vector<8x32xf32>
    %229 = vector.broadcast %208 : vector<1x32xf32> to vector<8x32xf32>
    %230 = arith.addf %228, %229 : vector<8x32xf32>
    %c0_91 = arith.constant 0 : index
    %c0_92 = arith.constant 0 : index
    %c0_93 = arith.constant 0 : index
    %231 = vector.load %arg29[%c0_91, %c0_92, %c0_93] : memref<1x8x32xf32, #tpu.memory_space<vmem>>, vector<1x8x32xf32>
    %232 = vector.shape_cast %231 : vector<1x8x32xf32> to vector<8x32xf32>
    %233 = vector.shape_cast %230 : vector<8x32xf32> to vector<1x8x32xf32>
    tpu.vector_store %arg29[%c0_91, %c0_92, %c0_93], %233 {strides = array<i32>} : memref<1x8x32xf32, #tpu.memory_space<vmem>>, vector<1x8x32xf32>,
    return
  }
  func.func @transform_0(%arg0: i32) -> (i32, i32, i32) {
    %c0_i32 = arith.constant 0 : i32
    %c0_i32_0 = arith.constant 0 : i32
    %c0_i32_1 = arith.constant 0 : i32
    return %arg0, %c0_i32, %c0_i32_0 : i32, i32, i32
  }
  func.func @transform_1(%arg0: i32) -> (i32, i32, i32) {
    %c0_i32 = arith.constant 0 : i32
    %c0_i32_0 = arith.constant 0 : i32
    %c0_i32_1 = arith.constant 0 : i32
    return %arg0, %c0_i32, %c0_i32_0 : i32, i32, i32
  }
  func.func @transform_2(%arg0: i32) -> (i32, i32, i32) {
    %c0_i32 = arith.constant 0 : i32
    %c0_i32_0 = arith.constant 0 : i32
    %c0_i32_1 = arith.constant 0 : i32
    return %arg0, %c0_i32, %c0_i32_0 : i32, i32, i32
  }
  func.func @transform_3(%arg0: i32) -> (i32, i32, i32) {
    %c0_i32 = arith.constant 0 : i32
    %c0_i32_0 = arith.constant 0 : i32
    %c0_i32_1 = arith.constant 0 : i32
    return %arg0, %c0_i32, %c0_i32_0 : i32, i32, i32
  }
  func.func @transform_4(%arg0: i32) -> (i32, i32) {
    %c0_i32 = arith.constant 0 : i32
    %c0_i32_0 = arith.constant 0 : i32
    %c0_i32_1 = arith.constant 0 : i32
    return %c0_i32, %c0_i32_0 : i32, i32
  }
  func.func @transform_5(%arg0: i32) -> (i32, i32) {
    %c0_i32 = arith.constant 0 : i32
    %c0_i32_0 = arith.constant 0 : i32
    %c0_i32_1 = arith.constant 0 : i32
    return %c0_i32, %c0_i32_0 : i32, i32
  }
  func.func @transform_6(%arg0: i32) -> (i32, i32) {
    %c0_i32 = arith.constant 0 : i32
    %c0_i32_0 = arith.constant 0 : i32
    %c0_i32_1 = arith.constant 0 : i32
    return %c0_i32, %c0_i32_0 : i32, i32
  }
  func.func @transform_7(%arg0: i32) -> (i32, i32) {
    %c0_i32 = arith.constant 0 : i32
    %c0_i32_0 = arith.constant 0 : i32
    %c0_i32_1 = arith.constant 0 : i32
    return %c0_i32, %c0_i32_0 : i32, i32
  }
  func.func @transform_8(%arg0: i32) -> (i32, i32) {
    %c0_i32 = arith.constant 0 : i32
    %c0_i32_0 = arith.constant 0 : i32
    %c0_i32_1 = arith.constant 0 : i32
    return %c0_i32, %c0_i32_0 : i32, i32
  }
  func.func @transform_9(%arg0: i32) -> (i32, i32) {
    %c0_i32 = arith.constant 0 : i32
    %c0_i32_0 = arith.constant 0 : i32
    %c0_i32_1 = arith.constant 0 : i32
    return %c0_i32, %c0_i32_0 : i32, i32
  }
  func.func @transform_10(%arg0: i32) -> (i32, i32) {
    %c0_i32 = arith.constant 0 : i32
    %c0_i32_0 = arith.constant 0 : i32
    %c0_i32_1 = arith.constant 0 : i32
    return %c0_i32, %c0_i32_0 : i32, i32
  }
  func.func @transform_11(%arg0: i32) -> (i32, i32) {
    %c0_i32 = arith.constant 0 : i32
    %c0_i32_0 = arith.constant 0 : i32
    %c0_i32_1 = arith.constant 0 : i32
    return %c0_i32, %c0_i32_0 : i32, i32
  }
  func.func @transform_12(%arg0: i32) -> (i32, i32) {
    %c0_i32 = arith.constant 0 : i32
    %c0_i32_0 = arith.constant 0 : i32
    %c0_i32_1 = arith.constant 0 : i32
    return %c0_i32, %c0_i32_0 : i32, i32
  }
  func.func @transform_13(%arg0: i32) -> (i32, i32) {
    %c0_i32 = arith.constant 0 : i32
    %c0_i32_0 = arith.constant 0 : i32
    %c0_i32_1 = arith.constant 0 : i32
    return %c0_i32, %c0_i32_0 : i32, i32
  }
  func.func @transform_14(%arg0: i32) -> (i32, i32) {
    %c0_i32 = arith.constant 0 : i32
    %c0_i32_0 = arith.constant 0 : i32
    %c0_i32_1 = arith.constant 0 : i32
    return %c0_i32, %c0_i32_0 : i32, i32
  }
  func.func @transform_15(%arg0: i32) -> (i32, i32) {
    %c0_i32 = arith.constant 0 : i32
    %c0_i32_0 = arith.constant 0 : i32
    %c0_i32_1 = arith.constant 0 : i32
    return %c0_i32, %c0_i32_0 : i32, i32
  }
  func.func @transform_16(%arg0: i32) -> (i32, i32) {
    %c0_i32 = arith.constant 0 : i32
    %c0_i32_0 = arith.constant 0 : i32
    %c0_i32_1 = arith.constant 0 : i32
    return %c0_i32, %c0_i32_0 : i32, i32
  }
  func.func @transform_17(%arg0: i32) -> (i32, i32) {
    %c0_i32 = arith.constant 0 : i32
    %c0_i32_0 = arith.constant 0 : i32
    %c0_i32_1 = arith.constant 0 : i32
    return %c0_i32, %c0_i32_0 : i32, i32
  }
  func.func @transform_18(%arg0: i32) -> (i32, i32) {
    %c0_i32 = arith.constant 0 : i32
    %c0_i32_0 = arith.constant 0 : i32
    %c0_i32_1 = arith.constant 0 : i32
    return %c0_i32, %c0_i32_0 : i32, i32
  }
  func.func @transform_19(%arg0: i32) -> (i32, i32) {
    %c0_i32 = arith.constant 0 : i32
    %c0_i32_0 = arith.constant 0 : i32
    %c0_i32_1 = arith.constant 0 : i32
    return %c0_i32, %c0_i32_0 : i32, i32
  }
  func.func @transform_20(%arg0: i32) -> (i32, i32) {
    %c0_i32 = arith.constant 0 : i32
    %c0_i32_0 = arith.constant 0 : i32
    %c0_i32_1 = arith.constant 0 : i32
    return %c0_i32, %c0_i32_0 : i32, i32
  }
  func.func @transform_21(%arg0: i32) -> (i32, i32) {
    %c0_i32 = arith.constant 0 : i32
    %c0_i32_0 = arith.constant 0 : i32
    %c0_i32_1 = arith.constant 0 : i32
    return %c0_i32, %c0_i32_0 : i32, i32
  }
  func.func @transform_22(%arg0: i32) -> (i32, i32) {
    %c0_i32 = arith.constant 0 : i32
    %c0_i32_0 = arith.constant 0 : i32
    %c0_i32_1 = arith.constant 0 : i32
    return %c0_i32, %c0_i32_0 : i32, i32
  }
  func.func @transform_23(%arg0: i32) -> (i32, i32) {
    %c0_i32 = arith.constant 0 : i32
    %c0_i32_0 = arith.constant 0 : i32
    %c0_i32_1 = arith.constant 0 : i32
    return %c0_i32, %c0_i32_0 : i32, i32
  }
  func.func @transform_24(%arg0: i32) -> (i32, i32) {
    %c0_i32 = arith.constant 0 : i32
    %c0_i32_0 = arith.constant 0 : i32
    %c0_i32_1 = arith.constant 0 : i32
    return %c0_i32, %c0_i32_0 : i32, i32
  }
  func.func @transform_25(%arg0: i32) -> (i32, i32) {
    %c0_i32 = arith.constant 0 : i32
    %c0_i32_0 = arith.constant 0 : i32
    %c0_i32_1 = arith.constant 0 : i32
    return %c0_i32, %c0_i32_0 : i32, i32
  }
  func.func @transform_26(%arg0: i32) -> (i32, i32) {
    %c0_i32 = arith.constant 0 : i32
    %c0_i32_0 = arith.constant 0 : i32
    %c0_i32_1 = arith.constant 0 : i32
    return %c0_i32, %c0_i32_0 : i32, i32
  }
  func.func @transform_27(%arg0: i32) -> (i32, i32) {
    %c0_i32 = arith.constant 0 : i32
    %c0_i32_0 = arith.constant 0 : i32
    %c0_i32_1 = arith.constant 0 : i32
    return %c0_i32, %c0_i32_0 : i32, i32
  }
  func.func @transform_28(%arg0: i32) -> (i32, i32, i32) {
    %c0_i32 = arith.constant 0 : i32
    %c0_i32_0 = arith.constant 0 : i32
    %c0_i32_1 = arith.constant 0 : i32
    return %arg0, %c0_i32, %c0_i32_0 : i32, i32, i32
  }
}

</mosaic_0001>

<bundles_post_ra>
// kernel: tpu_custom_call.1
= control target key start
LH: loop header
LB: loop body
LE: loop exit
PB: predicated region body
PF: predicated region fallthrough
CT: control target
= control target key end

     0   :  { %s5413_s0 = inlined_call_operand.hbm [shape: f32[2,8,32], index: 0, kind: input, shape index: {}]   ;;  %s5414_s1 = inlined_call_operand.hbm [shape: f32[2,8,32], index: 1, kind: input, shape index: {}]   ;;  %s5415_s2 = inlined_call_operand.vmem [shape: f32[2,16,32], index: 2, kind: input, shape index: {}]   ;;  %s5416_s3 = inlined_call_operand.vmem [shape: f32[2,16,32], index: 3, kind: input, shape index: {}]   ;;  %s5417_s4 = inlined_call_operand.vmem [shape: f32[32,64], index: 4, kind: input, shape index: {}]   ;;  %s5418_s5 = inlined_call_operand.vmem [shape: f32[1,64], index: 5, kind: input, shape index: {}]   ;;  %s5419_s6 = inlined_call_operand.hbm [shape: f32[32,32], index: 6, kind: input, shape index: {}]   ;;  %s5420_s7 = inlined_call_operand.vmem [shape: f32[1,32], index: 7, kind: input, shape index: {}]   ;;  %s5421_s8 = inlined_call_operand.hbm [shape: f32[32,32], index: 8, kind: input, shape index: {}]   ;;  %s5422_s9 = inlined_call_operand.vmem [shape: f32[1,32], index: 9, kind: input, shape index: {}]   ;;  %s5423_s10 = inlined_call_operand.hbm [shape: f32[32,32], index: 10, kind: input, shape index: {}]   ;;  %s5424_s11 = inlined_call_operand.vmem [shape: f32[1,32], index: 11, kind: input, shape index: {}]   ;;  %s5425_s12 = inlined_call_operand.hbm [shape: f32[32,32], index: 12, kind: input, shape index: {}]   ;;  %s5426_s13 = inlined_call_operand.hbm [shape: f32[1,32], index: 13, kind: input, shape index: {}]   ;;  %s5427_s14 = inlined_call_operand.hbm [shape: f32[32,32], index: 14, kind: input, shape index: {}]   ;;  %s5428_s15 = inlined_call_operand.hbm [shape: f32[1,32], index: 15, kind: input, shape index: {}]   ;;  %s5429_s16 = inlined_call_operand.hbm [shape: f32[32,32], index: 16, kind: input, shape index: {}]   ;;  %s5430_s17 = inlined_call_operand.hbm [shape: f32[1,32], index: 17, kind: input, shape index: {}]   ;;  %s5431_s18 = inlined_call_operand.hbm [shape: f32[32,64], index: 18, kind: input, shape index: {}]   ;;  %s5432_s19 = inlined_call_operand.hbm [shape: f32[1,64], index: 19, kind: input, shape index: {}]   ;;  %s5433_s20 = inlined_call_operand.vmem [shape: f32[64,32], index: 20, kind: input, shape index: {}]   ;;  %s5434_s21 = inlined_call_operand.vmem [shape: f32[1,32], index: 21, kind: input, shape index: {}]   ;;  %s5435_s22 = inlined_call_operand.vmem [shape: f32[1,32], index: 22, kind: input, shape index: {}]   ;;  %s5436_s23 = inlined_call_operand.vmem [shape: f32[1,32], index: 23, kind: input, shape index: {}]   ;;  %s5437_s24 = inlined_call_operand.vmem [shape: f32[1,32], index: 24, kind: input, shape index: {}]   ;;  %s5438_s25 = inlined_call_operand.vmem [shape: f32[1,32], index: 25, kind: input, shape index: {}]   ;;  %s5439_s26 = inlined_call_operand.vmem [shape: f32[1,32], index: 26, kind: input, shape index: {}]   ;;  %s5440_s27 = inlined_call_operand.vmem [shape: f32[1,32], index: 27, kind: input, shape index: {}]   ;;  %s5441_s28 = inlined_call_operand.hbm [shape: f32[2,8,32], index: 28, kind: output, shape index: {}]  }
   0x1   :  { %5454 = sst [smem:[#allocation36_spill]] %s5413_s0 }
   0x2   :  { %5455 = sst [smem:[#allocation37_spill]] %s5414_s1 }
   0x3   :  { %5456 = sst [smem:[#allocation38_spill]] %s5415_s2 }
   0x4   :  { %5457 = sst [smem:[#allocation39_spill]] %s5416_s3 }
   0x5   :  { %5458 = sst [smem:[#allocation40_spill]] %s5417_s4 }
   0x6   :  { %5459 = sst [smem:[#allocation41_spill]] %s5418_s5 }
   0x7   :  { %5460 = sst [smem:[#allocation42_spill]] %s5419_s6 }
   0x8   :  { %5461 = sst [smem:[#allocation43_spill]] %s5420_s7 }
   0x9   :  { %5462 = sst [smem:[#allocation44_spill]] %s5421_s8 }
   0xa   :  { %5463 = sst [smem:[#allocation45_spill]] %s5422_s9 }
   0xb   :  { %5464 = sst [smem:[#allocation46_spill]] %s5423_s10 }
   0xc   :  { %5465 = sst [smem:[#allocation47_spill]] %s5424_s11 }
   0xd   :  { %5466 = sst [smem:[#allocation48_spill]] %s5425_s12 }
   0xe   :  { %5467 = sst [smem:[#allocation49_spill]] %s5426_s13 }
   0xf   :  { %5468 = sst [smem:[#allocation50_spill]] %s5427_s14 }
  0x10   :  { %5469 = sst [smem:[#allocation51_spill]] %s5428_s15 }
  0x11   :  { %5470 = sst [smem:[#allocation52_spill]] %s5429_s16 }
  0x12   :  { %5471 = sst [smem:[#allocation53_spill]] %s5430_s17 }
  0x13   :  { %5472 = sst [smem:[#allocation54_spill]] %s5431_s18 }
  0x14   :  { %5473 = sst [smem:[#allocation55_spill]] %s5432_s19 }
  0x15   :  { %5474 = sst [smem:[#allocation56_spill]] %s5434_s21 }
  0x16   :  { %5475 = sst [smem:[#allocation57_spill]] %s5439_s26 }
  0x17   :  { %5476 = sst [smem:[#allocation58_spill]] %s5440_s27 }
  0x18   :  { %5477 = sst [smem:[#allocation59_spill]] %s5441_s28 }
  0x19   :  { %33 = vsyncpa [#allocation3], 0 }
  0x1a   :  { %35 = vsyncpa [#allocation3 + $0x1], 0 }
  0x1b   :  { %36 = vsyncpa [#allocation6], 0 }
  0x1c   :  { %38 = vsyncpa [#allocation6 + $0x1], 0 }
  0x1d   :  { %39 = vsyncpa [#allocation9], 0 }
  0x1e   :  { %40 = vsyncpa [#allocation12], 0 }
  0x1f   :  { %41 = vsyncpa [#allocation15], 0 }
  0x20   :  { %42 = vsyncpa [#allocation18], 0 }
  0x21   :  { %43 = vsyncpa [#allocation21], 0 }
  0x22   :  { %44 = vsyncpa [#allocation4], 0 }
  0x23   :  { %46 = vsyncpa [#allocation4 + $0x1], 0  ;;  %s4790_s8 = smov 0   ;;  %s4792_s5 = smov 0  }
  0x24   :  { %s4794_s9 = smov 0   ;;  %s4796_s30 = smov 0  }
  0x25 LB: > { %5478 = sst [smem:[#allocation33_spill]] %s4614_s9  ;;  %s4620_s3 = smov [#allocation7]   ;;  %s4618_s30 = sphi %s4796_s30, %s5531_s30   ;;  %s4614_s9 = sphi %s4794_s9, %s5533_s9   ;;  %s4610_s5 = sphi %s4792_s5, %s5535_s5   ;;  %s4606_s8 = sphi %s4790_s8, %s5534_s8  }
  0x26   : > { %s709_s6 = sshll.u32 %s4620_s3, 4  ;;  %s4811_s10 = sadd.s32 4294967295, %s4618_s30   ;;  %s710_s6 = int_to_ptr.vmem [resolvable:$true] %s709_s6 }
  0x27   : > { %p3583_p0 = scmp.ge.s32.totalorder %s4618_s30, 1  ;;  %p5446_p1 = scmp.eq.s32.totalorder %s4811_s10, 0 }
  0x28   : > { %p691_p2 = scmp.lt.s32.totalorder %s4618_s30, 3  ;;  %s4621_s11 = smov [#allocation8]  }
  0x29   : > { %s725_s29 = sshll.u32 %s4621_s11, 4  ;;  %s4622_s7 = smov [#allocation11]   ;;  %s4829_s29 = int_to_ptr.vmem [resolvable:$true] %s725_s29 }
  0x2a   : > { %p4816_p3 = pnand %p3583_p0, %p691_p2  ;;  %s757_s12 = sshll.u32 %s4622_s7, 4  ;;  %s4831_s12 = int_to_ptr.vmem [resolvable:$true] %s757_s12 }
  0x2b   : > { %s4195_s4 = scalar_lea.vmem %s710_s6, 512  ;;  %p4203_p11 = scmp.lt.s32.totalorder %s710_s6, %s710_s6 }
  0x2c   : > { %s5479_s0 = scalar_select %p4816_p3, 1, 0 }
  0x2d   : > { %p4023_p5 = pneg %p4816_p3  ;;  %p4196_p8 = scmp.ne.s32.totalorder %s710_s6, %s4195_s4 }
  0x2e   : > { %p4204_p12 = scmp.lt.s32.totalorder %s4195_s4, %s4195_s4 }
  0x2f   : > { %p4825_p6 = pnand %p4023_p5, %p5446_p1 }
  0x30   : > { %p4205_p13 = por %p4204_p12, %p4203_p11 }
  0x31   : > { %p4835_p7 = pneg %p4825_p6 }
  0x33   : > { %p4198_p9 = pnand %p4196_p8, %p4835_p7 }
  0x35   : > { %p4199_p10 = pneg %p4198_p9 }
  0x37   : > { %p4206_p0 = pnand %p4205_p13, %p4199_p10 }
  0x39   : > { %4209 = shalt.err (!%p4206_p0)
}
  0x3a   : > { %s4623_s3 = smov 128   ;;  %s4624_s11 = smov 8  }
  0x3b   : > { %s5482_s27 = sld [smem:[#allocation42_spill]]  ;;  %s4221_s26 = scalar_lea.vmem %s4829_s29, 512 }
  0x3c   : > { %p4222_p2 = scmp.ne.s32.totalorder %s4829_s29, %s4221_s26  ;;  %p4229_p9 = scmp.lt.s32.totalorder %s4829_s29, %s4829_s29 }
  0x3d   : > { %p4230_p10 = scmp.lt.s32.totalorder %s4221_s26, %s4221_s26 }
  0x3e   : > { %p4224_p5 = pnand %p4222_p2, %p4835_p7 }
  0x3f   : > { %p4231_p11 = por %p4230_p10, %p4229_p9 }
  0x40   : > { %p4225_p8 = pneg %p4224_p5 }
  0x41   : > { %4026 = dma.hbm_to_vmem [thread:$0]  (!%p4825_p6), %s5482_s27, 512, %s710_s6, [#allocation6], %s4623_s3, %s4623_s3, %s4624_s11  }
  0x42   : > { %p4232_p12 = pnand %p4231_p11, %p4225_p8 }
  0x44   : > { %4235 = shalt.err (!%p4232_p12)
}
  0x45   : > { %s5483_s27 = sld [smem:[#allocation44_spill]]  ;;  %s4247_s6 = scalar_lea.vmem %s4831_s12, 512 }
  0x46   : > { %p4248_p13 = scmp.ne.s32.totalorder %s4831_s12, %s4247_s6  ;;  %p4255_p5 = scmp.lt.s32.totalorder %s4831_s12, %s4831_s12 }
  0x47   : > { %p4256_p8 = scmp.lt.s32.totalorder %s4247_s6, %s4247_s6 }
  0x48   : > { %p4250_p0 = pnand %p4248_p13, %p4835_p7 }
  0x49   : > { %p4257_p9 = por %p4256_p8, %p4255_p5 }
  0x4a   : > { %p4251_p2 = pneg %p4250_p0 }
  0x4b   : > { %4029 = dma.hbm_to_vmem [thread:$0]  (!%p4825_p6), %s5483_s27, 512, %s4829_s29, [#allocation9], %s4623_s3, %s4623_s3, %s4624_s11  }
  0x4c   : > { %p4258_p10 = pnand %p4257_p9, %p4251_p2 }
  0x4e   : > { %4261 = shalt.err (!%p4258_p10)
}
  0x4f   : > { %s5484_s29 = sld [smem:[#allocation48_spill]]  ;;  %s4625_s4 = smov [#allocation14]  }
  0x50   : > { %s781_s28 = sshll.u32 %s4625_s4, 4  ;;  %s4626_s27 = smov [#allocation17]   ;;  %s782_s28 = int_to_ptr.vmem [resolvable:$true] %s781_s28 }
  0x51   : > { %s805_s21 = sshll.u32 %s4626_s27, 4  ;;  %s4273_s6 = scalar_lea.vmem %s782_s28, 512  ;;  %s806_s21 = int_to_ptr.vmem [resolvable:$true] %s805_s21 }
  0x52   : > { %p4274_p11 = scmp.ne.s32.totalorder %s782_s28, %s4273_s6  ;;  %p4281_p0 = scmp.lt.s32.totalorder %s782_s28, %s782_s28 }
  0x53   : > { %p4282_p2 = scmp.lt.s32.totalorder %s4273_s6, %s4273_s6 }
  0x54   : > { %p4276_p12 = pnand %p4274_p11, %p4835_p7 }
  0x55   : > { %4035 = dma.hbm_to_vmem [thread:$0]  (!%p4825_p6), %s5484_s29, 512, %s4831_s12, [#allocation12], %s4623_s3, %s4623_s3, %s4624_s11  }
  0x56   : > { %p4277_p13 = pneg %p4276_p12  ;;  %p4283_p5 = por %p4282_p2, %p4281_p0 }
  0x58   : > { %p4284_p8 = pnand %p4283_p5, %p4277_p13 }
  0x5a   : > { %4287 = shalt.err (!%p4284_p8)
}
  0x5b   : > { %s5485_s14 = sld [smem:[#allocation50_spill]]  ;;  %s4299_s7 = scalar_lea.vmem %s806_s21, 512 }
  0x5c   : > { %p4300_p9 = scmp.ne.s32.totalorder %s806_s21, %s4299_s7  ;;  %p4307_p12 = scmp.lt.s32.totalorder %s806_s21, %s806_s21 }
  0x5d   : > { %p4308_p0 = scmp.lt.s32.totalorder %s4299_s7, %s4299_s7 }
  0x5e   : > { %p4302_p10 = pnand %p4300_p9, %p4835_p7 }
  0x5f   : > { %p4309_p13 = por %p4308_p0, %p4307_p12 }
  0x60   : > { %p4303_p11 = pneg %p4302_p10 }
  0x61   : > { %4041 = dma.hbm_to_vmem [thread:$0]  (!%p4825_p6), %s5485_s14, 512, %s782_s28, [#allocation15], %s4623_s3, %s4623_s3, %s4624_s11  }
  0x62   : > { %p4310_p2 = pnand %p4309_p13, %p4303_p11 }
  0x64   : > { %4313 = shalt.err (!%p4310_p2)
}
  0x65   : > { %s5486_s16 = sld [smem:[#allocation52_spill]]  ;;  %s4627_s28 = smov [#allocation20]  }
  0x66   : > { %s829_s27 = sshll.u32 %s4627_s28, 4  ;;  %s4628_s6 = smov [#allocation10]   ;;  %s830_s27 = int_to_ptr.vmem [resolvable:$true] %s829_s27 }
  0x67   : > { %s741_s12 = sshll.u32 %s4628_s6, 4  ;;  %s4325_s26 = scalar_lea.vmem %s830_s27, 512  ;;  %s742_s12 = int_to_ptr.vmem [resolvable:$true] %s741_s12 }
  0x68   : > { %p4326_p5 = scmp.ne.s32.totalorder %s830_s27, %s4325_s26  ;;  %p4333_p10 = scmp.lt.s32.totalorder %s830_s27, %s830_s27 }
  0x69   : > { %p4334_p11 = scmp.lt.s32.totalorder %s4325_s26, %s4325_s26 }
  0x6a   : > { %p4328_p8 = pnand %p4326_p5, %p4835_p7 }
  0x6b   : > { %4047 = dma.hbm_to_vmem [thread:$0]  (!%p4825_p6), %s5486_s16, 512, %s806_s21, [#allocation18], %s4623_s3, %s4623_s3, %s4624_s11  }
  0x6c   : > { %p4329_p9 = pneg %p4328_p8  ;;  %p4335_p12 = por %p4334_p11, %p4333_p10 }
  0x6e   : > { %p4336_p0 = pnand %p4335_p12, %p4329_p9 }
  0x70   : > { %4339 = shalt.err (!%p4336_p0)
}
  0x71   : > { %s5487_s18 = sld [smem:[#allocation54_spill]]  ;;  %s4351_s29 = scalar_lea.vmem %s742_s12, 512 }
  0x72   : > { %p4352_p13 = scmp.ne.s32.totalorder %s742_s12, %s4351_s29  ;;  %p4359_p8 = scmp.lt.s32.totalorder %s742_s12, %s742_s12 }
  0x73   : > { %p4360_p10 = scmp.lt.s32.totalorder %s4351_s29, %s4351_s29 }
  0x74   : > { %p4354_p2 = pnand %p4352_p13, %p4835_p7 }
  0x75   : > { %p4361_p9 = por %p4360_p10, %p4359_p8 }
  0x76   : > { %p4355_p5 = pneg %p4354_p2 }
  0x77   : > { %4053 = dma.hbm_to_vmem [thread:$0]  (!%p4825_p6), %s5487_s18, 512, %s830_s27, [#allocation21], %s4623_s3, %s4623_s3, %s4624_s11  }
  0x78   : > { %p4362_p11 = pnand %p4361_p9, %p4355_p5 }
  0x7a   : > { %4365 = shalt.err (!%p4362_p11)
}
  0x7b   : > { %s5488_s6 = sld [smem:[#allocation46_spill]]  ;;  %s4629_s27 = smov [#allocation13]  }
  0x7c   : > { %s771_s26 = sshll.u32 %s4629_s27, 4  ;;  %s4630_s21 = smov [#allocation16]   ;;  %s772_s26 = int_to_ptr.vmem [resolvable:$true] %s771_s26 }
  0x7d   : > { %s795_s7 = sshll.u32 %s4630_s21, 4  ;;  %s4377_s14 = scalar_lea.vmem %s772_s26, 16  ;;  %s796_s7 = int_to_ptr.vmem [resolvable:$true] %s795_s7 }
  0x7e   : > { %p4378_p12 = scmp.ne.s32.totalorder %s772_s26, %s4377_s14  ;;  %s4384_s29 = scalar_lea.vmem %s772_s26, 32 }
  0x7f   : > { %p4385_p2 = scmp.lt.s32.totalorder %s772_s26, %s772_s26  ;;  %p4386_p5 = scmp.lt.s32.totalorder %s4384_s29, %s4377_s14 }
  0x80   : > { %p4380_p0 = pnand %p4378_p12, %p4835_p7 }
  0x81   : > { %4032 = dma.hbm_to_vmem [thread:$0]  (!%p4825_p6), %s5488_s6, 512, %s742_s12, [#allocation9], %s4623_s3, %s4623_s3, %s4624_s11  }
  0x82   : > { %p4381_p13 = pneg %p4380_p0  ;;  %p4387_p8 = por %p4386_p5, %p4385_p2 }
  0x84   : > { %p4388_p10 = pnand %p4387_p8, %p4381_p13 }
  0x86   : > { %4391 = shalt.err (!%p4388_p10)
}
  0x87   : > { %s5489_s13 = sld [smem:[#allocation49_spill]]  ;;  %s4403_s11 = scalar_lea.vmem %s796_s7, 16 }
  0x88   : > { %p4404_p9 = scmp.ne.s32.totalorder %s796_s7, %s4403_s11  ;;  %s4410_s12 = scalar_lea.vmem %s796_s7, 32 }
  0x89   : > { %p4411_p0 = scmp.lt.s32.totalorder %s796_s7, %s796_s7  ;;  %p4412_p4 = scmp.lt.s32.totalorder %s4410_s12, %s4403_s11 }
  0x8a   : > { %p4406_p11 = pnand %p4404_p9, %p4835_p7 }
  0x8b   : > { %p4413_p1 = por %p4412_p4, %p4411_p0 }
  0x8c   : > { %p4407_p12 = pneg %p4406_p11 }
  0x8d   : > { %4038 = dma.hbm_to_vmem [thread:$0]  (!%p4825_p6), %s5489_s13, 16, %s772_s26, [#allocation12]  }
  0x8e   : > { %p4414_p2 = pnand %p4413_p1, %p4407_p12 }
  0x90   : > { %4417 = shalt.err (!%p4414_p2)
}
  0x91   : > { %s5490_s15 = sld [smem:[#allocation51_spill]]  ;;  %s4631_s6 = smov [#allocation19]  }
  0x92   : > { %s819_s27 = sshll.u32 %s4631_s6, 4  ;;  %s4632_s26 = smov [#allocation22]   ;;  %s820_s27 = int_to_ptr.vmem [resolvable:$true] %s819_s27 }
  0x93   : > { %s843_s21 = sshll.u32 %s4632_s26, 4  ;;  %s4429_s29 = scalar_lea.vmem %s820_s27, 16  ;;  %s844_s21 = int_to_ptr.vmem [resolvable:$true] %s843_s21 }
  0x94   : > { %p4430_p13 = scmp.ne.s32.totalorder %s820_s27, %s4429_s29  ;;  %s4436_s4 = scalar_lea.vmem %s820_s27, 32 }
  0x95   : > { %p4437_p1 = scmp.lt.s32.totalorder %s820_s27, %s820_s27  ;;  %p4438_p4 = scmp.lt.s32.totalorder %s4436_s4, %s4429_s29 }
  0x96   : > { %p4432_p5 = pnand %p4430_p13, %p4835_p7 }
  0x97   : > { %4044 = dma.hbm_to_vmem [thread:$0]  (!%p4825_p6), %s5490_s15, 16, %s796_s7, [#allocation15]  }
  0x98   : > { %p4433_p8 = pneg %p4432_p5  ;;  %p4439_p10 = por %p4438_p4, %p4437_p1 }
  0x9a   : > { %p4440_p9 = pnand %p4439_p10, %p4433_p8 }
  0x9c   : > { %4443 = shalt.err (!%p4440_p9)
}
  0x9d   : > { %s5491_s17 = sld [smem:[#allocation53_spill]]  ;;  %s4455_s11 = scalar_lea.vmem %s844_s21, 16 }
  0x9e   : > { %p4456_p11 = scmp.ne.s32.totalorder %s844_s21, %s4455_s11  ;;  %s4462_s12 = scalar_lea.vmem %s844_s21, 32 }
  0x9f   : > { %p4463_p2 = scmp.lt.s32.totalorder %s844_s21, %s844_s21  ;;  %p4464_p13 = scmp.lt.s32.totalorder %s4462_s12, %s4455_s11 }
  0xa0   : > { %p4458_p12 = pnand %p4456_p11, %p4835_p7 }
  0xa1   : > { %p4465_p5 = por %p4464_p13, %p4463_p2 }
  0xa2   : > { %p4459_p0 = pneg %p4458_p12 }
  0xa3   : > { %4050 = dma.hbm_to_vmem [thread:$0]  (!%p4825_p6), %s5491_s17, 16, %s820_s27, [#allocation18]  }
  0xa4   : > { %p4466_p1 = pnand %p4465_p5, %p4459_p0 }
  0xa6   : > { %4469 = shalt.err (!%p4466_p1)
}
  0xa7   : > { %s5492_s19 = sld [smem:[#allocation55_spill]]  ;;  %s3582_s1 = sadd.s32 4294967294, %s4618_s30  }
  0xa8   : > { %s4949_s2 = sadd.s32 1, %s4618_s30   ;;  %s59_s6 = sadd.s32 1, %s4614_s9 }
  0xa9   : > { %5493 = sst [smem:[#allocation34_spill]] %s4949_s2  ;;  %s56_s27 = ssub.s32 %s4618_s30, %s4949_s2 }
  0xaa   : > { %p66_p7 = scmp.ne.s32.totalorder %s4614_s9, %s4610_s5  ;;  %p57_p8 = scmp.eq.s32.totalorder %s56_s27, 0 }
  0xab   : > { %p67_p4 = scmp.eq.s32.totalorder %s4618_s30, 0  ;;  %p72_p10 = scmp.ne.s32.totalorder %s4610_s5, %s4606_s8 }
  0xac   : > { %p678_p9 = scmp.eq.s32.totalorder %s4811_s10, 1  ;;  %p5495_p12 = scmp.eq.s32.totalorder %s4811_s10, 0 }
  0xad   : > { %4056 = dma.hbm_to_vmem [thread:$0]  (!%p4825_p6), %s5492_s19, 16, %s844_s21, [#allocation21]  }
  0xae   : > { %s4961_s26 = scalar_select %p57_p8, %s4614_s9, %s59_s6  }
  0xaf   : > { %p68_p11 = por %p67_p4, %p66_p7  ;;  %p4965_p0 = por %p5495_p12, %p72_p10 }
  0xb0   : > { %5494 = sst [smem:[#allocation35_spill]] %s4961_s26  ;;  %p4969_p6 = por %p678_p9, %p66_p7 }
  0xb1   : > { %s5496_s29 = scalar_select %p4965_p0, 1, 0 }
  0xb2   : > { %s5497_s21 = scalar_select %p4969_p6, 1, 0 }
  0xb3   : > { %p684_p2 = scmp.eq.s32.totalorder %s3582_s1, 1  ;;  %p4079_p13 = scmp.lt.s32.totalorder %s4618_s30, 2 }
  0xb4   : > { %s878_s4 = sand.u32 1, %s4614_s9   ;;  %s3597_s11 = sshll.u32 %s4618_s30, 7 }
  0xb5   : > { %p4975_p5 = por %p684_p2, %p72_p10  ;;  %s4979_s7 = sshll.u32 %s878_s4, 3 }
  0xb6   : > { %s5499_s28 = sld [smem:[#allocation36_spill]]  ;;  %s882_s27 = scalar_lea.vmem [#allocation2], %s4979_s7 }
  0xb7   : > { %s5498_s3 = scalar_select %p4975_p5, 1, 0 }
  0xb8   : > { %s889_s1 = sshll.u32 %s882_s27, 4  ;;  %p4988_p1 = pnand %p4079_p13, %p68_p11  ;;  %s890_s1 = int_to_ptr.vmem [resolvable:$true] %s889_s1 }
  0xb9   : > { %s5501_s17 = sld [smem:[#allocation37_spill]]  ;;  %s879_s12 = scalar_lea.sflag [#allocation3], %s878_s4 }
  0xba   : > { %p4472_p8 = pneg %p4988_p1 }
  0xbc   : > { %s4985_s6 = scalar_lea.hbm %s5499_s28, %s3597_s11  ;;  %s4475_s26 = scalar_lea.hbm %s5499_s28, 256 }
  0xbd   : > { %s4470_s14 = scalar_lea.hbm %s4985_s6, 128  ;;  %p4476_p9 = scmp.lt.s32.totalorder %s4985_s6, %s5499_s28 }
  0xbe   : > { %p4471_p7 = scmp.ne.s32.totalorder %s4985_s6, %s4470_s14  ;;  %p4477_p11 = scmp.lt.s32.totalorder %s4475_s26, %s4470_s14 }
  0xbf   : > { %s4995_s18 = scalar_lea.hbm %s5501_s17, %s3597_s11 }
  0xc0   : > { %p4473_p4 = pnand %p4472_p8, %p4471_p7  ;;  %p4478_p12 = por %p4477_p11, %p4476_p9 }
  0xc2   : > { %p4474_p10 = pneg %p4473_p4 }
  0xc4   : > { %p4479_p2 = pnand %p4478_p12, %p4474_p10 }
  0xc6   : > { %4482 = shalt.err (!%p4479_p2)
}
  0xc7   : > { %s4483_s15 = scalar_lea.vmem %s890_s1, 128  ;;  %s4633_s16 = smov [#allocation2]  }
  0xc8   : > { %p4484_p13 = scmp.ne.s32.totalorder %s890_s1, %s4483_s15  ;;  %s4488_s4 = sshll.u32 %s4633_s16, 4  ;;  %s4489_s4 = int_to_ptr.vmem [resolvable:$false] %s4488_s4 }
  0xc9   : > { %s4490_s19 = scalar_lea.vmem %s4489_s4, 256  ;;  %p4491_p4 = scmp.lt.s32.totalorder %s890_s1, %s4489_s4 }
  0xca   : > { %p4486_p5 = pnand %p4484_p13, %p4472_p8  ;;  %p4492_p6 = scmp.lt.s32.totalorder %s4490_s19, %s4483_s15 }
  0xcc   : > { %p4487_p7 = pneg %p4486_p5  ;;  %p4493_p0 = por %p4492_p6, %p4491_p4 }
  0xce   : > { %p4494_p3 = pnand %p4493_p0, %p4487_p7 }
  0xd0   : > { %4497 = shalt.err (!%p4494_p3)
}
  0xd1   : > { %4060 = dma.hbm_to_vmem [thread:$0]  (!%p4988_p1), %s4985_s6, 128, %s890_s1, %s879_s12  }
  0xd2   : > { %s896_s9 = sand.u32 1, %s4618_s30   ;;  %s900_s2 = scalar_lea.vmem [#allocation5], %s4979_s7 }
  0xd3   : > { %s907_s26 = sshll.u32 %s900_s2, 4  ;;  %s897_s11 = scalar_lea.sflag [#allocation6], %s896_s9  ;;  %s908_s26 = int_to_ptr.vmem [resolvable:$true] %s907_s26 }
  0xd4   : > { %s4498_s14 = scalar_lea.hbm %s4995_s18, 128  ;;  %s4503_s16 = scalar_lea.hbm %s5501_s17, 256 }
  0xd5   : > { %p4499_p5 = scmp.ne.s32.totalorder %s4995_s18, %s4498_s14  ;;  %p4504_p6 = scmp.lt.s32.totalorder %s4995_s18, %s5501_s17 }
  0xd6   : > { %p4505_p10 = scmp.lt.s32.totalorder %s4503_s16, %s4498_s14 }
  0xd7   : > { %p4501_p3 = pnand %p4499_p5, %p4472_p8 }
  0xd8   : > { %p4506_p9 = por %p4505_p10, %p4504_p6 }
  0xd9   : > { %p4502_p0 = pneg %p4501_p3 }
  0xdb   : > { %p4507_p11 = pnand %p4506_p9, %p4502_p0 }
  0xdd   : > { %4510 = shalt.err (!%p4507_p11)
}
  0xde   : > { %s4511_s7 = scalar_lea.vmem %s908_s26, 128  ;;  %s4634_s6 = smov [#allocation5]  }
  0xdf   : > { %p4512_p12 = scmp.ne.s32.totalorder %s908_s26, %s4511_s7  ;;  %s4516_s1 = sshll.u32 %s4634_s6, 4  ;;  %s4517_s1 = int_to_ptr.vmem [resolvable:$false] %s4516_s1 }
  0xe0   : > { %s4518_s12 = scalar_lea.vmem %s4517_s1, 256  ;;  %p4519_p7 = scmp.lt.s32.totalorder %s908_s26, %s4517_s1 }
  0xe1   : > { %p4514_p2 = pnand %p4512_p12, %p4472_p8  ;;  %p4520_p4 = scmp.lt.s32.totalorder %s4518_s12, %s4511_s7 }
  0xe3   : > { %p4515_p13 = pneg %p4514_p2  ;;  %p4521_p5 = por %p4520_p4, %p4519_p7 }
  0xe5   : > { %p4522_p3 = pnand %p4521_p5, %p4515_p13 }
  0xe7   : > { %4525 = shalt.err (!%p4522_p3)
}
  0xe8   : > { %4063 = dma.hbm_to_vmem [thread:$0]  (!%p4988_p1), %s4995_s18, 128, %s908_s26, %s897_s11  }
  0xe9   : > { %p5502_p0 = scmp.ne.s32.totalorder %s5479_s0, 0 }
  0xea   : > { %s5040_s9 = sand.u32 (!%p5502_p0), 1, %s4610_s5   ;;  %p5503_p8 = scmp.ne.s32.totalorder (!%p5502_p0), %s5496_s29, 0 }
  0xeb   : > { %932 = sbr.rel (%p5502_p0) target bundleno = 4011 (0xfab), region = 132  ;;  %s5043_s2 = sshll.u32 (!%p5502_p0), %s5040_s9, 3 }
  0xec   : > { %s935_s14 = scalar_lea.sflag (!%p5502_p0), [#allocation3], %s5040_s9  ;;  %s938_s27 = scalar_lea.vmem (!%p5502_p0), [#allocation2], %s5043_s2 }
  0xf0   : > { %4569 = dma.done.wait (%p5503_p8), %s935_s14, 128  }
  0xf1   : > { %4571 = vsyncadd (%p5503_p8), %s935_s14, 4294967168  ;;  %s943_s13 = sand.u32 1, %s4811_s10   ;;  %s947_s0 = scalar_lea.vmem [#allocation5], %s5043_s2 }
  0xf2   : > { %s944_s18 = scalar_lea.sflag [#allocation6], %s943_s13 }
  0xf3   : > { %4573 = dma.done.wait (%p5503_p8), %s944_s18, 128  }
  0xf4   : > { %4575 = vsyncadd (%p5503_p8), %s944_s18, 4294967168  ;;  %p5504_p1 = scmp.eq.s32.totalorder %s4811_s10, 0 }
  0xf6   : > { %4577 = dma.done.wait (%p5504_p1), [#allocation6], 512   ;;  %p5505_p6 = pmov %p5504_p1 }
  0xf7   : > { %p5506_p10 = pmov %p5504_p1 }
  0xf8   : > { %4579 = vsyncadd (%p5505_p6), [#allocation6], 4294966784 }
  0xf9   : > { %4581 = dma.done.wait (%p5506_p10), [#allocation9], 1024   ;;  %p5507_p9 = pmov %p5504_p1 }
  0xfa   : > { %p5508_p11 = pmov %p5504_p1 }
  0xfb   : > { %4583 = vsyncadd (%p5507_p9), [#allocation9], 4294966272 }
  0xfc   : > { %4585 = dma.done.wait (%p5508_p11), [#allocation12], 528   ;;  %p5509_p12 = pmov %p5504_p1 }
  0xfd   : > { %p5510_p2 = pmov %p5504_p1 }
  0xfe   : > { %4587 = vsyncadd (%p5509_p12), [#allocation12], 4294966768 }
  0xff   : > { %4589 = dma.done.wait (%p5510_p2), [#allocation15], 528   ;;  %p5511_p13 = pmov %p5504_p1 }
 0x100   : > { %p5512_p7 = pmov %p5504_p1 }
 0x101   : > { %4591 = vsyncadd (%p5511_p13), [#allocation15], 4294966768 }
 0x102   : > { %4593 = dma.done.wait (%p5512_p7), [#allocation18], 528   ;;  %p5513_p4 = pmov %p5504_p1 }
 0x103   : > { %p5514_p5 = pmov %p5504_p1 }
 0x104   : > { %4595 = vsyncadd (%p5513_p4), [#allocation18], 4294966768 }
 0x105   : > { %4597 = dma.done.wait (%p5514_p5), [#allocation21], 528   ;;  %p5515_p3 = pmov %p5504_p1 }
 0x106   : > { %v4635_v0 = vmov 0.0   ;;  %vm4636_vm0 = vmmov 0   ;;  %s5516_s11 = sld [smem:[#allocation40_spill]]  ;;  %v5093_v3 = vld [vmem:[%s938_s27] sm:$0xff]  ;;  %v5095_v4 = vld [vmem:[%s947_s0] sm:$0xff]  ;;  %vm1107_vm1 = vcmask 261120  }
 0x107   : > { %4599 = vsyncadd (%p5515_p3), [#allocation21], 4294966768  ;;  %3770 = vmatprep.subr.mxu1 %v4635_v0  ;;  %3778 = vmatprep.mubr.msk.f32.mxu1 %vm4636_vm0, %v4635_v0  ;;  %v1095_v7 = vadd.f32 %v5095_v4, %v5093_v3  ;;  %v1184_v8 = vld [vmem:[#allocation7 + $0x18] sm:$0xff]  ;;  %v1183_v9 = vld [vmem:[#allocation7 + $0x10] sm:$0xff]  ;;  %s5517_s14 = sld [smem:[#allocation41_spill]]  ;;  %s4637_s27 = smov 104  }
 0x108   : > { %3792 = vmatprep.subr.mxu0 %v4635_v0  ;;  %3794 = vmatprep.mubr.msk.f32.mxu0 %vm4636_vm0, %v4635_v0  ;;  %v1182_v11 = vld [vmem:[#allocation7 + $0x8] sm:$0xff]  ;;  %v1181_v15 = vld [vmem:[#allocation7] sm:$0xff]  ;;  %s4638_s13 = smov 120   ;;  %s4639_s18 = smov 96   ;;  %vm1289_vm2 = vcmask 64512   ;;  %vm1941_vm3 = vcmask 130048  }
 0x109   : > { %s4640_s0 = smov 112   ;;  %s5518_s15 = sld [smem:[#allocation43_spill]]  ;;  %vm1943_vm4 = vcmask 195584   ;;  %vm3240_vm5 = vcmask 523264  }
 0x10a   : > { %s4641_s16 = smov 8   ;;  %s4642_s4 = smov 16  }
 0x10b   : > { %s5453_s19 = smov 24   ;;  %s5519_s1 = sld [smem:[#allocation45_spill]] }
 0x10c   : > { %v1099_v1 = vld [vmem:[%s5516_s11 + $0x18] sm:$0xff]  ;;  %v1098_v2 = vld [vmem:[%s5516_s11 + $0x10] sm:$0xff]  ;;  %v1097_v5 = vld [vmem:[%s5516_s11 + $0x8] sm:$0xff]  ;;  %p1079_p0 = scmp.lt.s32.totalorder %s4811_s10, 1  ;;  %s5520_s26 = sld [smem:[#allocation38_spill]] }
 0x10d   : > { %3771 = vmatpush3.msra.mxu1 %v1099_v1  ;;  %v1096_v6 = vld [vmem:[%s5516_s11] sm:$0xff]  ;;  %s5527_s7 = sld [smem:[#allocation59_spill]]  ;;  %p5528_p1 = scmp.ne.s32.totalorder %s5497_s21, 0 }
 0x10e   : > { %3772 = vmatprep.subr.mxu1 %v4635_v0  ;;  %v3619_v10 = vld [vmem:[%s5517_s14] ss:$0 sm:$0xff]  ;;  %s1080_s12 = scalar_select %p1079_p0, %s4811_s10, 1 }
 0x10f   : > { %3773 = vmatpush3.msra.mxu1 %v1098_v2  ;;  %v3621_v23 = vld [vmem:[%s5518_s15] ss:$0 sm:$0xff] }
 0x110   : > { %3774 = vmatprep.subr.mxu1 %v4635_v0  ;;  %s3677_s14 = sshll.u32 %s1080_s12, 4  ;;  %s4644_s12 = smov [#allocation23]  }
 0x111   : > { %3775 = vmatpush3.msra.mxu1 %v1097_v5 }
 0x112   : > { %3776 = vmatprep.subr.mxu1 %v4635_v0  ;;  %s1083_s15 = scalar_lea.vmem %s5520_s26, %s3677_s14 }
 0x113   : > { %3777 = vmatpush3.msra.mxu1 %v1096_v6 }
 0x114   : > { %3779 = vmatmul.mubr.msk.f32.vlgmr.msra.gmra.mxu1 %vm1107_vm1, %v1095_v7  ;;  %3781 = vmatprep.subr.mxu1 %v4635_v0 }
 0x115   : > { %3789 = vmatprep.mubr.msk.f32.mxu1 %vm4636_vm0, %v4635_v0  ;;  %3782 = vmatpush3.msra.mxu1 %v1184_v8 }
 0x116   : > { %3783 = vmatprep.subr.mxu1 %v4635_v0 }
 0x117   : > { %3784 = vmatpush3.msra.mxu1 %v1183_v9 }
 0x118   : > { %3785 = vmatprep.subr.mxu1 %v4635_v0 }
 0x119   : > { %3786 = vmatpush3.msra.mxu1 %v1182_v11 }
 0x11a   : > { %3787 = vmatprep.subr.mxu1 %v4635_v0 }
 0x11b   : > { %3788 = vmatpush3.msra.mxu1 %v1181_v15  ;;  %v1268_v15 = vld [vmem:[#allocation8 + $0x18] sm:$0xff] }
 0x11c   : > { %3790 = vmatmul.mubr.msk.f32.vlgmr.msra.gmra.mxu1 %vm1107_vm1, %v5093_v3  ;;  %3797 = vmatprep.subr.mxu1 %v4635_v0 }
 0x11d   : > { %3799 = vmatprep.mubr.msk.f32.mxu1 %vm4636_vm0, %v4635_v0 }
 0x1d4   : > { %v1177_v12 = vpop.f32.mrf.mxu1 }
 0x1d5   : > { %v1178_v13 = vadd.f32 %v3619_v10, %v1177_v12 }
 0x1d6   : > { %v3780_v14 = vpop.f32.mrf.mxu1 }
 0x1d7   : > { %1275 = vrot.lane.b32.xlu1 %v1178_v13, %s4637_s27  ;;  %1271 = vrot.lane.b32.xlu0 %v1178_v13, %s4638_s13 }
 0x1db   : > { %1287 = vrot.lane.b32.xlu1 %v1178_v13, %s4639_s18  ;;  %1273 = vrot.lane.b32.xlu0 %v1178_v13, %s4640_s0 }
 0x1dc   : > { %v1261_v20 = vpop.f32.mrf.mxu1 }
 0x1dd   : > { %v1262_v26 = vadd.f32 %v3621_v23, %v1261_v20 }
 0x1de   : > { %v3791_v21 = vpop.f32.mrf.mxu1 }
 0x249   : > { %v1276_v16 = vpop.permute.xlu1 %1275  ;;  %v1272_v17 = vpop.permute.xlu0 %1271 }
 0x24a   : > { %1364 = vrot.lane.b32.xlu0 %v1272_v17, %s4639_s18 }
 0x24d   : > { %v1288_v18 = vpop.permute.xlu1 %1287  ;;  %v1274_v19 = vpop.permute.xlu0 %1273 }
 0x24e   : > { %3793 = vmatpush3.xpose.msk.msra.mxu0 %vm1289_vm2, %v1288_v18  ;;  %1516 = vrot.lane.b32.xlu0 %v1276_v16, %s4639_s18 }
 0x24f   : > { %1440 = vrot.lane.b32.xlu1 %v1274_v19, %s4639_s18  ;;  %3802 = vmatprep.subr.mxu0 %v4635_v0  ;;  %s5525_s18 = sld [smem:[#allocation57_spill]] }
 0x251   : > { %3795 = vmatmul.mubr.msk.f32.vlgmr.msra.gmra.mxu0 %vm1289_vm2, %v1178_v13 }
 0x252   : > { %3804 = vmatprep.mubr.msk.f32.mxu0 %vm4636_vm0, %v4635_v0 }
 0x2bc   : > { %v1365_v22 = vpop.permute.xlu0 %1364 }
 0x2bd   : > { %3798 = vmatpush3.xpose.msk.msra.mxu1 %vm1289_vm2, %v1365_v22  ;;  %v1265_v22 = vld [vmem:[#allocation8] sm:$0xff] }
 0x2be   : > { %3807 = vmatprep.subr.mxu1 %v4635_v0 }
 0x2c0   : > { %3800 = vmatmul.mubr.msk.f32.vlgmr.msra.gmra.mxu1 %vm1289_vm2, %v1272_v17  ;;  %v1517_v24 = vpop.permute.xlu0 %1516  ;;  %v1266_v17 = vld [vmem:[#allocation8 + $0x8] sm:$0xff] }
 0x2c1   : > { %v1441_v25 = vpop.permute.xlu1 %1440  ;;  %3808 = vmatpush3.xpose.msk.msra.mxu1 %vm1289_vm2, %v1517_v24  ;;  %3809 = vmatprep.mubr.msk.f32.mxu1 %vm4636_vm0, %v4635_v0 }
 0x2c2   : > { %3803 = vmatpush3.xpose.msk.msra.mxu0 %vm1289_vm2, %v1441_v25  ;;  %3817 = vmatprep.subr.mxu1 %v4635_v0 }
 0x2c3   : > { %3812 = vmatprep.subr.mxu0 %v4635_v0 }
 0x2c4   : > { %3810 = vmatmul.mubr.msk.f32.vlgmr.msra.gmra.mxu1 %vm1289_vm2, %v1276_v16  ;;  %v1267_v16 = vld [vmem:[#allocation8 + $0x10] sm:$0xff] }
 0x2c5   : > { %3805 = vmatmul.mubr.msk.f32.vlgmr.msra.gmra.mxu0 %vm1289_vm2, %v1274_v19  ;;  %3819 = vmatprep.mubr.msk.f32.mxu1 %vm4636_vm0, %v4635_v0 }
 0x2c6   : > { %3813 = vmatpush3.msra.mxu0 %v1262_v26  ;;  %3814 = vmatprep.mubr.msk.f32.mxu0 %vm4636_vm0, %v4635_v0 }
 0x2c7   : > { %3822 = vmatprep.subr.mxu0 %v4635_v0 }
 0x311   : > { %v1360_v27 = vpop.f32.mrf.mxu0 }
 0x312   : > { %v1592_v28 = vsel %vm1289_vm2, %v1360_v27, -inf }
 0x313   : > { %v3796_v29 = vpop.f32.mrf.mxu0  ;;  %1593 = vmax.xlane.f32.xlu1 %v1592_v28 }
 0x380   : > { %v1436_v30 = vpop.f32.mrf.mxu1 }
 0x381   : > { %v1595_v31 = vsel %vm1289_vm2, %v1436_v30, -inf }
 0x382   : > { %1596 = vmax.xlane.f32.xlu0 %v1595_v31  ;;  %v3801_v32 = vpop.f32.mrf.mxu1  ;;  %v3635_v31 = vld [vmem:[%s5519_s1] ss:$0 sm:$0xff]  ;;  %s5521_s1 = sld [smem:[#allocation39_spill]] }
 0x384   : > { %v1588_v33 = vpop.f32.mrf.mxu1 }
 0x385   : > { %v1512_v34 = vpop.f32.mrf.mxu0  ;;  %v1601_v35 = vsel %vm1289_vm2, %v1588_v33, -inf }
 0x386   : > { %v1598_v36 = vsel %vm1289_vm2, %v1512_v34, -inf  ;;  %1602 = vmax.xlane.f32.xlu1 %v1601_v35  ;;  %v3811_v37 = vpop.f32.mrf.mxu1 }
 0x387   : > { %v3806_v38 = vpop.f32.mrf.mxu0  ;;  %1599 = vmax.xlane.f32.xlu0 %v1598_v36 }
 0x39c   : > { %v1594_v39 = vpop.xlane.xlu1 %1593 }
 0x39d   : > { %v1604_v40 = vsub.f32 %v1360_v27, %v1594_v39  ;;  %v2147_v39 = vld [vmem:[#allocation11 + $0x18] sm:$0xff] }
 0x39f   : > { %v1608_v41 = vmul.f32 1.442695, %v1604_v40  ;;  %v2146_v40 = vld [vmem:[#allocation11 + $0x10] sm:$0xff] }
 0x3a1   : > { %4146 = vpow2.f32 %v1608_v41  ;;  %v2145_v41 = vld [vmem:[#allocation11 + $0x8] sm:$0xff] }
 0x3ae   : > { %v4147_v42 = vpop.eup %4146 }
 0x3af   : > { %v1616_v43 = vsel %vm1289_vm2, %v4147_v42, 0.0 }
 0x3b0   : > { %1617 = vadd.xlane.f32.xlu0 %v1616_v43  ;;  %v2144_v43 = vld [vmem:[#allocation11] sm:$0xff] }
 0x40b   : > { %v1597_v44 = vpop.xlane.xlu0 %1596 }
 0x40c   : > { %v1605_v45 = vsub.f32 %v1436_v30, %v1597_v44  ;;  %v5200_v44 = vld [vmem:[%s1083_s15 + $0x8] sm:$0xff] }
 0x40e   : > { %v1610_v46 = vmul.f32 1.442695, %v1605_v45 }
 0x40f   : > { %v1603_v54 = vpop.xlane.xlu1 %1602 }
 0x410   : > { %4148 = vpow2.f32 %v1610_v46  ;;  %v1600_v47 = vpop.xlane.xlu0 %1599  ;;  %v1607_v56 = vsub.f32 %v1588_v33, %v1603_v54 }
 0x411   : > { %v1606_v48 = vsub.f32 %v1512_v34, %v1600_v47 }
 0x412   : > { %v1614_v57 = vmul.f32 1.442695, %v1607_v56 }
 0x413   : > { %v1612_v49 = vmul.f32 1.442695, %v1606_v48  ;;  %v2061_v48 = vld [vmem:[#allocation10 + $0x18] sm:$0xff] }
 0x415   : > { %4150 = vpow2.f32 %v1612_v49  ;;  %v2060_v49 = vld [vmem:[#allocation10 + $0x10] sm:$0xff] }
 0x41d   : > { %v4149_v50 = vpop.eup %4148 }
 0x41e   : > { %v1619_v51 = vsel %vm1289_vm2, %v4149_v50, 0.0 }
 0x41f   : > { %1620 = vadd.xlane.f32.xlu1 %v1619_v51  ;;  %v2058_v51 = vld [vmem:[#allocation10] sm:$0xff] }
 0x422   : > { %v4151_v52 = vpop.eup %4150 }
 0x423   : > { %v1622_v53 = vsel %vm1289_vm2, %v4151_v52, 0.0 }
 0x424   : > { %1623 = vadd.xlane.f32.xlu0 %v1622_v53 }
 0x430   : > { %1281 = vrot.lane.b32.xlu1 %v1262_v26, %s4640_s0 }
 0x439   : > { %v1618_v55 = vpop.xlane.xlu0 %1617 }
 0x43a   : > { %1278 = vrot.lane.b32.xlu0 %v1262_v26, %s4638_s13  ;;  %4152 = vrcp.f32 %v1618_v55 }
 0x43b   : > { %4154 = vpow2.f32 %v1614_v57 }
 0x447   : > { %v4153_v58 = vpop.eup %4152 }
 0x448   : > { %v1632_v59 = vmul.f32 %v4153_v58, %v4147_v42  ;;  %v4155_v60 = vpop.eup %4154 }
 0x449   : > { %v1625_v61 = vsel %vm1289_vm2, %v4155_v60, 0.0 }
 0x44a   : > { %3815 = vmatmul.mubr.msk.f32.vlgmr.msra.gmra.mxu0 %vm1289_vm2, %v1632_v59 }
 0x44b   : > { %3824 = vmatprep.mubr.msk.f32.mxu0 %vm4636_vm0, %v4635_v0 }
 0x454   : > { %1626 = vadd.xlane.f32.xlu1 %v1625_v61  ;;  %v3637_v61 = vld [vmem:[%s5435_s22] ss:$0 sm:$0xff] }
 0x465   : > { %1284 = vrot.lane.b32.xlu1 %v1262_v26, %s4637_s27 }
 0x4a8   : > { %v1621_v62 = vpop.xlane.xlu1 %1620 }
 0x4a9   : > { %4156 = vrcp.f32 %v1621_v62 }
 0x4ac   : > { %v1282_v63 = vpop.permute.xlu1 %1281 }
 0x4ad   : > { %v1624_v1 = vpop.xlane.xlu0 %1623  ;;  %3823 = vmatpush3.msra.mxu0 %v1282_v63  ;;  %v3638_v63 = vld [vmem:[%s5436_s23] ss:$0 sm:$0xff] }
 0x4ae   : > { %4158 = vrcp.f32 %v1624_v1  ;;  %3832 = vmatprep.subr.mxu0 %v4635_v0 }
 0x4b1   : > { %v1279_v2 = vpop.permute.xlu0 %1278 }
 0x4b2   : > { %3818 = vmatpush3.msra.mxu1 %v1279_v2 }
 0x4b3   : > { %3827 = vmatprep.subr.mxu1 %v4635_v0 }
 0x4b6   : > { %v4157_v5 = vpop.eup %4156 }
 0x4b7   : > { %v1633_v6 = vmul.f32 %v4157_v5, %v4149_v50  ;;  %v2059_v50 = vld [vmem:[#allocation10 + $0x8] sm:$0xff] }
 0x4b9   : > { %3820 = vmatmul.mubr.msk.f32.vlgmr.msra.gmra.mxu1 %vm1289_vm2, %v1633_v6  ;;  %v3641_v6 = vld [vmem:[#allocation13] ss:$0 sm:$0xff] }
 0x4ba   : > { %3829 = vmatprep.mubr.msk.f32.mxu1 %vm4636_vm0, %v4635_v0 }
 0x4bb   : > { %v4159_v7 = vpop.eup %4158 }
 0x4bc   : > { %v1634_v8 = vmul.f32 %v4159_v7, %v4151_v52 }
 0x4be   : > { %3825 = vmatmul.mubr.msk.f32.vlgmr.msra.gmra.mxu0 %vm1289_vm2, %v1634_v8 }
 0x4bf   : > { %3840 = vmatprep.mubr.msk.f32.mxu0 %vm4636_vm0, %v4635_v0  ;;  %3833 = vmatpush3.msra.mxu0 %v1268_v15 }
 0x4c0   : > { %3834 = vmatprep.subr.mxu0 %v4635_v0 }
 0x4c1   : > { %3835 = vmatpush3.msra.mxu0 %v1267_v16 }
 0x4c2   : > { %3836 = vmatprep.subr.mxu0 %v4635_v0 }
 0x4c3   : > { %3837 = vmatpush3.msra.mxu0 %v1266_v17 }
 0x4c4   : > { %3838 = vmatprep.subr.mxu0 %v4635_v0 }
 0x4c5   : > { %3839 = vmatpush3.msra.mxu0 %v1265_v22 }
 0x4c6   : > { %3854 = vmatprep.subr.mxu0 %v2147_v39 }
 0x4dd   : > { %v1627_v9 = vpop.xlane.xlu1 %1626 }
 0x4de   : > { %4160 = vrcp.f32 %v1627_v9 }
 0x4e1   : > { %v1285_v10 = vpop.permute.xlu1 %1284 }
 0x4e2   : > { %3828 = vmatpush3.msra.mxu1 %v1285_v10 }
 0x4e3   : > { %3843 = vmatprep.subr.mxu1 %v4635_v0 }
 0x4eb   : > { %v4161_v11 = vpop.eup %4160 }
 0x4ec   : > { %v1635_v12 = vmul.f32 %v4161_v11, %v4155_v60  ;;  %v2238_v11 = vld [vmem:[#allocation14 + $0x10] sm:$0xff] }
 0x4ee   : > { %3830 = vmatmul.mubr.msk.f32.vlgmr.msra.gmra.mxu1 %vm1289_vm2, %v1635_v12  ;;  %v2237_v12 = vld [vmem:[#allocation14 + $0x8] sm:$0xff] }
 0x4ef   : > { %3851 = vmatprep.mubr.msk.f32.mxu1 %vm4636_vm0, %v4635_v0  ;;  %3844 = vmatpush3.msra.mxu1 %v2061_v48 }
 0x4f0   : > { %3845 = vmatprep.subr.mxu1 %v4635_v0 }
 0x4f1   : > { %3846 = vmatpush3.msra.mxu1 %v2060_v49 }
 0x4f2   : > { %3847 = vmatprep.subr.mxu1 %v4635_v0 }
 0x4f3   : > { %3848 = vmatpush3.msra.mxu1 %v2059_v50 }
 0x4f4   : > { %3849 = vmatprep.subr.mxu1 %v4635_v0 }
 0x4f5   : > { %3850 = vmatpush3.msra.mxu1 %v2058_v51 }
 0x50a   : > { %v1705_v13 = vpop.f32.mrf.mxu0 }
 0x50c   : > { %v3816_v14 = vpop.f32.mrf.mxu0 }
 0x579   : > { %v1778_v18 = vpop.f32.mrf.mxu1 }
 0x57a   : > { %1929 = vrot.lane.b32.xlu0 %v1778_v18, %s4641_s16 }
 0x57b   : > { %v3821_v19 = vpop.f32.mrf.mxu1 }
 0x57e   : > { %v1851_v20 = vpop.f32.mrf.mxu0 }
 0x57f   : > { %1933 = vrot.lane.b32.xlu1 %v1851_v20, %s4642_s4 }
 0x580   : > { %v3826_v21 = vpop.f32.mrf.mxu0 }
 0x5ae   : > { %v1924_v23 = vpop.f32.mrf.mxu1 }
 0x5af   : > { %1937 = vrot.lane.b32.xlu0 %v1924_v23, %s5453_s19  ;;  %s1088_s19 = scalar_lea.vmem %s5521_s1, %s3677_s14  ;;  %s3348_s1 = scalar_lea.sflag [#allocation4], %s5040_s9 }
 0x5b0   : > { %v3831_v24 = vpop.f32.mrf.mxu1  ;;  %v1093_v42 = vld [vmem:[%s1088_s19] sm:$0xff]  ;;  %v1094_v45 = vld [vmem:[%s1088_s19 + $0x8] sm:$0xff]  ;;  %s5524_s19 = sld [smem:[#allocation56_spill]]  ;;  %s4530_s14 = sshll.u32 %s4644_s12, 4  ;;  %s4531_s14 = int_to_ptr.vmem [resolvable:$false] %s4530_s14 }
 0x5b1   : > { %v2143_v47 = vadd.f32 %v1094_v45, %v5200_v44 }
 0x5ec   : > { %v1930_v25 = vpop.permute.xlu0 %1929 }
 0x5ed   : > { %v1940_v27 = vsel %vm1289_vm2, %v1705_v13, %v1930_v25  ;;  %v2236_v13 = vld [vmem:[#allocation14] sm:$0xff] }
 0x5ee   : > { %v3644_v25 = vld [vmem:[#allocation16] ss:$0 sm:$0xff] }
 0x5f1   : > { %v1934_v26 = vpop.permute.xlu1 %1933 }
 0x5f2   : > { %v1942_v28 = vsel %vm1941_vm3, %v1940_v27, %v1934_v26 }
 0x621   : > { %v1938_v29 = vpop.permute.xlu0 %1937 }
 0x622   : > { %v1944_v30 = vsel %vm1943_vm4, %v1942_v28, %v1938_v29 }
 0x623   : > { %3841 = vmatmul.mubr.msk.f32.vlgmr.msra.gmra.mxu0 %vm1107_vm1, %v1944_v30 }
 0x624   : > { %3855 = vmatpush3.msra.mxu0 %v2147_v39 }
 0x625   : > { %3856 = vmatprep.subr.mxu0 %v2146_v40 }
 0x626   : > { %3857 = vmatpush3.msra.mxu0 %v2146_v40 }
 0x627   : > { %3858 = vmatprep.subr.mxu0 %v2145_v41 }
 0x628   : > { %3859 = vmatpush3.msra.mxu0 %v2145_v41 }
 0x629   : > { %3860 = vmatprep.subr.mxu0 %v2144_v43 }
 0x62a   : > { %3861 = vmatpush3.msra.mxu0 %v2144_v43 }
 0x62b   : > { %3876 = vmatprep.subr.mxu0 %v4635_v0 }
 0x6e3   : > { %v2020_v32 = vpop.f32.mrf.mxu0 }
 0x6e4   : > { %v2021_v33 = vadd.f32 %v3635_v31, %v2020_v32 }
 0x6e5   : > { %v3842_v34 = vpop.f32.mrf.mxu0 }
 0x6e6   : > { %v2024_v35 = vadd.f32 %v2021_v33, %v5093_v3  ;;  %v1091_v3 = vld [vmem:[%s1083_s15] sm:$0xff]  ;;  %s5522_s15 = sld [smem:[#allocation47_spill]] }
 0x6e7   : > { %v2142_v46 = vadd.f32 %v1093_v42, %v1091_v3 }
 0x6e8   : > { %v2027_v36 = vsel %vm1107_vm1, %v2024_v35, 0.0  ;;  %v2032_v37 = vmul.f32 %v2024_v35, %v2024_v35 }
 0x6e9   : > { %2028 = vadd.xlane.f32.xlu1 %v2027_v36  ;;  %3862 = vmatprep.mubr.msk.f32.mxu0 %vm1107_vm1, %v2142_v46 }
 0x6ea   : > { %v2033_v38 = vsel %vm1107_vm1, %v2032_v37, 0.0  ;;  %3863 = vmatmul.mubr.msk.f32.vlgmr.msra.gmra.mxu0 %vm1107_vm1, %v2143_v47 }
 0x6eb   : > { %2034 = vadd.xlane.f32.xlu0 %v2033_v38  ;;  %3880 = vmatprep.mubr.msk.f32.mxu0 %vm4636_vm0, %v4635_v0 }
 0x6ec   : > { %v3639_v17 = vld [vmem:[%s5522_s15] ss:$0 sm:$0xff]  ;;  %s5526_s15 = sld [smem:[#allocation58_spill]] }
 0x772   : > { %v2029_v52 = vpop.xlane.xlu1 %2028 }
 0x773   : > { %v2031_v53 = vmul.f32 0.03125, %v2029_v52 }
 0x774   : > { %v2035_v54 = vpop.xlane.xlu0 %2034 }
 0x775   : > { %v2037_v55 = vmul.f32 %v2031_v53, %v2031_v53  ;;  %v2036_v56 = vmul.f32 0.03125, %v2035_v54  ;;  %v2039_v59 = vsub.f32 %v2024_v35, %v2031_v53 }
 0x777   : > { %v2038_v57 = vsub.f32 %v2036_v56, %v2037_v55 }
 0x779   : > { %v2040_v58 = vadd.f32 1e-05, %v2038_v57 }
 0x77b   : > { %4162 = vrsqrt.f32 %v2040_v58 }
 0x788   : > { %v4163_v60 = vpop.eup %4162 }
 0x789   : > { %v2042_v62 = vmul.f32 %v4163_v60, %v2039_v59 }
 0x78b   : > { %v2049_v1 = vmul.f32 %v3637_v61, %v2042_v62 }
 0x78d   : > { %v5217_v2 = vadd.f32 %v3638_v63, %v2049_v1 }
 0x78f   : > { %v2057_v5 = vadd.f32 %v5217_v2, %v5095_v4  ;;  %v2239_v4 = vld [vmem:[#allocation14 + $0x18] sm:$0xff] }
 0x790   : > { %3865 = vmatprep.subr.mxu1 %v2239_v4 }
 0x791   : > { %3852 = vmatmul.mubr.msk.f32.vlgmr.msra.gmra.mxu1 %vm1107_vm1, %v2057_v5 }
 0x792   : > { %3873 = vmatprep.mubr.msk.f32.mxu1 %vm1107_vm1, %v1091_v3  ;;  %3866 = vmatpush3.msra.mxu1 %v2239_v4 }
 0x793   : > { %3867 = vmatprep.subr.mxu1 %v2238_v11 }
 0x794   : > { %3868 = vmatpush3.msra.mxu1 %v2238_v11 }
 0x795   : > { %3869 = vmatprep.subr.mxu1 %v2237_v12 }
 0x796   : > { %3870 = vmatpush3.msra.mxu1 %v2237_v12 }
 0x797   : > { %3871 = vmatprep.subr.mxu1 %v2236_v13 }
 0x798   : > { %3872 = vmatpush3.msra.mxu1 %v2236_v13 }
 0x799   : > { %3883 = vmatprep.subr.mxu1 %v4635_v0  ;;  %3874 = vmatmul.mubr.msk.f32.vlgmr.msra.gmra.mxu1 %vm1107_vm1, %v5200_v44 }
 0x79a   : > { %3887 = vmatprep.mubr.msk.f32.mxu1 %vm4636_vm0, %v4635_v0 }
 0x7aa   : > { %v3864_v7 = vpop.f32.mrf.mxu0 }
 0x7ab   : > { %v2233_v8 = vadd.f32 %v3864_v7, %v3641_v6 }
 0x7ac   : > { %v2227_v9 = vpop.f32.mrf.mxu0 }
 0x7ad   : > { %2348 = vrot.lane.b32.xlu1 %v2233_v8, %s4640_s0  ;;  %v2228_v10 = vadd.f32 %v3641_v6, %v2227_v9  ;;  %2344 = vrot.lane.b32.xlu0 %v2233_v8, %s4638_s13 }
 0x7ae   : > { %3877 = vmatpush3.xpose.msk.msra.mxu0 %vm1289_vm2, %v2233_v8 }
 0x7af   : > { %3878 = vmatprep.subr.mxu0 %v4635_v0 }
 0x7b1   : > { %2342 = vrot.lane.b32.xlu1 %v2228_v10, %s4638_s13 }
 0x7b2   : > { %3879 = vmatpush3.xpose.msk.msra.mxu0 %vm1289_vm2, %v2228_v10 }
 0x7b3   : > { %3890 = vmatprep.subr.mxu0 %v4635_v0 }
 0x7b5   : > { %2352 = vrot.lane.b32.xlu1 %v2233_v8, %s4637_s27 }
 0x7b9   : > { %2350 = vrot.lane.b32.xlu1 %v2228_v10, %s4637_s27 }
 0x81f   : > { %v2349_v14 = vpop.permute.xlu1 %2348  ;;  %v2345_v15 = vpop.permute.xlu0 %2344 }
 0x820   : > { %3884 = vmatpush3.xpose.msk.msra.mxu1 %vm1289_vm2, %v2345_v15 }
 0x821   : > { %3885 = vmatprep.subr.mxu1 %v4635_v0 }
 0x823   : > { %v2343_v16 = vpop.permute.xlu1 %2342 }
 0x824   : > { %3886 = vmatpush3.xpose.msk.msra.mxu1 %vm1289_vm2, %v2343_v16 }
 0x825   : > { %3897 = vmatprep.subr.mxu1 %v4635_v0 }
 0x827   : > { %v2353_v21 = vpop.permute.xlu1 %2352 }
 0x82b   : > { %v2351_v24 = vpop.permute.xlu1 %2350 }
 0x851   : > { %v2138_v18 = vpop.f32.mrf.mxu1 }
 0x852   : > { %v2139_v19 = vadd.f32 %v3639_v17, %v2138_v18 }
 0x853   : > { %v3853_v20 = vpop.f32.mrf.mxu1 }
 0x854   : > { %2338 = vrot.lane.b32.xlu1 %v2139_v19, %s4637_s27  ;;  %2334 = vrot.lane.b32.xlu0 %v2139_v19, %s4638_s13 }
 0x855   : > { %3881 = vmatmul.mubr.msk.f32.vlgmr.msra.gmra.mxu0 %vm1289_vm2, %v2139_v19 }
 0x856   : > { %3891 = vmatpush3.xpose.msk.msra.mxu0 %vm1289_vm2, %v2349_v14  ;;  %3894 = vmatprep.mubr.msk.f32.mxu0 %vm4636_vm0, %v4635_v0 }
 0x857   : > { %3892 = vmatprep.subr.mxu0 %v4635_v0 }
 0x858   : > { %2346 = vrot.lane.b32.xlu0 %v2228_v10, %s4640_s0 }
 0x859   : > { %v3875_v23 = vpop.f32.mrf.mxu1 }
 0x85a   : > { %v2325_v28 = vadd.f32 %v3875_v23, %v3644_v25  ;;  %v2330_v23 = vld [vmem:[#allocation17 + $0x10] sm:$0xff] }
 0x85b   : > { %v2319_v27 = vpop.f32.mrf.mxu1 }
 0x85c   : > { %2336 = vrot.lane.b32.xlu0 %v2139_v19, %s4640_s0  ;;  %v5262_v31 = vadd.f32 %v3644_v25, %v2319_v27 }
 0x8c6   : > { %v2335_v22 = vpop.permute.xlu0 %2334  ;;  %v2339_v29 = vpop.permute.xlu1 %2338 }
 0x8c7   : > { %3888 = vmatmul.mubr.msk.f32.vlgmr.msra.gmra.mxu1 %vm1289_vm2, %v2335_v22  ;;  %v2331_v22 = vld [vmem:[#allocation17 + $0x18] sm:$0xff] }
 0x8c8   : > { %3898 = vmatpush3.xpose.msk.msra.mxu1 %vm1289_vm2, %v2353_v21  ;;  %3901 = vmatprep.mubr.msk.f32.mxu1 %vm4636_vm0, %v4635_v0 }
 0x8c9   : > { %3899 = vmatprep.subr.mxu1 %v4635_v0 }
 0x8ca   : > { %v2347_v26 = vpop.permute.xlu0 %2346 }
 0x8cb   : > { %3893 = vmatpush3.xpose.msk.msra.mxu0 %vm1289_vm2, %v2347_v26  ;;  %v2328_v26 = vld [vmem:[#allocation17] sm:$0xff] }
 0x8cc   : > { %3900 = vmatpush3.xpose.msk.msra.mxu1 %vm1289_vm2, %v2351_v24  ;;  %3904 = vmatprep.subr.mxu0 %v4635_v0  ;;  %v2329_v24 = vld [vmem:[#allocation17 + $0x8] sm:$0xff] }
 0x8cd   : > { %3911 = vmatprep.subr.mxu1 %v4635_v0 }
 0x8ce   : > { %v2337_v30 = vpop.permute.xlu0 %2336 }
 0x8cf   : > { %3902 = vmatmul.mubr.msk.f32.vlgmr.msra.gmra.mxu1 %vm1289_vm2, %v2339_v29  ;;  %3895 = vmatmul.mubr.msk.f32.vlgmr.msra.gmra.mxu0 %vm1289_vm2, %v2337_v30 }
 0x8d0   : > { %3905 = vmatpush3.msra.mxu0 %v2325_v28  ;;  %3908 = vmatprep.mubr.msk.f32.mxu0 %vm4636_vm0, %v4635_v0 }
 0x8d1   : > { %3906 = vmatprep.subr.mxu0 %v4635_v0  ;;  %3915 = vmatprep.mubr.msk.f32.mxu1 %vm4636_vm0, %v4635_v0 }
 0x8d2   : > { %3907 = vmatpush3.msra.mxu0 %v5262_v31 }
 0x8d3   : > { %3918 = vmatprep.subr.mxu0 %v4635_v0 }
 0x915   : > { %v2446_v32 = vpop.f32.mrf.mxu0 }
 0x916   : > { %v2678_v33 = vsel %vm1941_vm3, %v2446_v32, -inf }
 0x917   : > { %2679 = vmax.xlane.f32.xlu0 %v2678_v33  ;;  %v3882_v34 = vpop.f32.mrf.mxu0 }
 0x987   : > { %v2522_v35 = vpop.f32.mrf.mxu1 }
 0x988   : > { %v2681_v36 = vsel %vm1941_vm3, %v2522_v35, -inf }
 0x989   : > { %2682 = vmax.xlane.f32.xlu1 %v2681_v36  ;;  %v3889_v37 = vpop.f32.mrf.mxu1 }
 0x98f   : > { %v2674_v38 = vpop.f32.mrf.mxu1  ;;  %v2598_v39 = vpop.f32.mrf.mxu0 }
 0x990   : > { %v2684_v40 = vsel %vm1941_vm3, %v2598_v39, -inf  ;;  %v2687_v42 = vsel %vm1941_vm3, %v2674_v38, -inf }
 0x991   : > { %v3903_v41 = vpop.f32.mrf.mxu1  ;;  %2685 = vmax.xlane.f32.xlu0 %v2684_v40  ;;  %v3896_v3 = vpop.f32.mrf.mxu0 }
 0x995   : > { %2688 = vmax.xlane.f32.xlu0 %v2687_v42 }
 0x99a   : > { %2358 = vrot.lane.b32.xlu1 %v2325_v28, %s4638_s13 }
 0x99e   : > { %2364 = vrot.lane.b32.xlu1 %v2325_v28, %s4640_s0 }
 0x9a0   : > { %v2680_v43 = vpop.xlane.xlu0 %2679 }
 0x9a1   : > { %v2690_v44 = vsub.f32 %v2446_v32, %v2680_v43 }
 0x9a2   : > { %2370 = vrot.lane.b32.xlu1 %v2325_v28, %s4637_s27 }
 0x9a3   : > { %v2694_v45 = vmul.f32 1.442695, %v2690_v44 }
 0x9a5   : > { %4164 = vpow2.f32 %v2694_v45  ;;  %v3143_v45 = vld [vmem:[#allocation20 + $0x18] sm:$0xff] }
 0x9ab   : > { %2356 = vrot.lane.b32.xlu0 %v5262_v31, %s4638_s13  ;;  %s1078_s13 = scalar_lea.vmem [#allocation23], %s5043_s2 }
 0x9b2   : > { %v4165_v46 = vpop.eup %4164 }
 0x9b3   : > { %v2702_v47 = vsel %vm1941_vm3, %v4165_v46, 0.0 }
 0x9c6   : > { %2703 = vadd.xlane.f32.xlu1 %v2702_v47  ;;  %v3141_v47 = vld [vmem:[#allocation20 + $0x8] sm:$0xff] }
 0xa12   : > { %v2683_v48 = vpop.xlane.xlu1 %2682 }
 0xa13   : > { %v2691_v49 = vsub.f32 %v2522_v35, %v2683_v48  ;;  %v3140_v48 = vld [vmem:[#allocation20] sm:$0xff] }
 0xa15   : > { %v2696_v50 = vmul.f32 1.442695, %v2691_v49  ;;  %v3231_v49 = vld [vmem:[%s5433_s20 + $0x30] sm:$0xff] }
 0xa16   : > { %v2359_v51 = vpop.permute.xlu1 %2358 }
 0xa17   : > { %4166 = vpow2.f32 %v2696_v50  ;;  %3912 = vmatpush3.msra.mxu1 %v2359_v51  ;;  %v3230_v50 = vld [vmem:[%s5433_s20 + $0x28] sm:$0xff]  ;;  %v3229_v51 = vld [vmem:[%s5433_s20 + $0x20] sm:$0xff] }
 0xa18   : > { %3913 = vmatprep.subr.mxu1 %v4635_v0 }
 0xa1a   : > { %v2686_v52 = vpop.xlane.xlu0 %2685  ;;  %v2365_v5 = vpop.permute.xlu1 %2364 }
 0xa1b   : > { %v2692_v53 = vsub.f32 %v2598_v39, %v2686_v52  ;;  %v3228_v52 = vld [vmem:[%s5433_s20 + $0x18] sm:$0xff] }
 0xa1d   : > { %v2698_v54 = vmul.f32 1.442695, %v2692_v53 }
 0xa1e   : > { %v2689_v55 = vpop.xlane.xlu0 %2688  ;;  %v2371_v6 = vpop.permute.xlu1 %2370 }
 0xa1f   : > { %4168 = vpow2.f32 %v2698_v54  ;;  %v2693_v56 = vsub.f32 %v2674_v38, %v2689_v55  ;;  %v3663_v38 = vld [vmem:[#allocation19] ss:$0 sm:$0xff] }
 0xa21   : > { %v2700_v57 = vmul.f32 1.442695, %v2693_v56 }
 0xa22   : > { %v2357_v58 = vpop.permute.xlu0 %2356 }
 0xa23   : > { %4170 = vpow2.f32 %v2700_v57  ;;  %3914 = vmatpush3.msra.mxu1 %v2357_v58 }
 0xa24   : > { %v4167_v59 = vpop.eup %4166  ;;  %3925 = vmatprep.subr.mxu1 %v4635_v0 }
 0xa25   : > { %v2705_v60 = vsel %vm1941_vm3, %v4167_v59, 0.0 }
 0xa26   : > { %2706 = vadd.xlane.f32.xlu0 %v2705_v60 }
 0xa2c   : > { %v4169_v61 = vpop.eup %4168 }
 0xa2d   : > { %v2708_v62 = vsel %vm1941_vm3, %v4169_v61, 0.0 }
 0xa2e   : > { %2709 = vadd.xlane.f32.xlu1 %v2708_v62  ;;  %v3665_v62 = vld [vmem:[%s5437_s24] ss:$0 sm:$0xff] }
 0xa30   : > { %v4171_v63 = vpop.eup %4170 }
 0xa31   : > { %v2711_v1 = vsel %vm1941_vm3, %v4171_v63, 0.0 }
 0xa32   : > { %2712 = vadd.xlane.f32.xlu0 %v2711_v1  ;;  %v3666_v1 = vld [vmem:[%s5438_s25] ss:$0 sm:$0xff] }
 0xa3f   : > { %2368 = vrot.lane.b32.xlu1 %v5262_v31, %s4637_s27  ;;  %s5523_s27 = smov 24  }
 0xa48   : > { %2362 = vrot.lane.b32.xlu0 %v5262_v31, %s4640_s0  ;;  %s3361_s0 = sshll.u32 %s1078_s13, 4  ;;  %s3362_s0 = int_to_ptr.vmem [resolvable:$true] %s3361_s0 }
 0xa49   : > { %p4533_p9 = scmp.lt.s32.totalorder %s3362_s0, %s4531_s14 }
 0xa4f   : > { %v2704_v7 = vpop.xlane.xlu1 %2703 }
 0xa50   : > { %4172 = vrcp.f32 %v2704_v7  ;;  %v3227_v7 = vld [vmem:[%s5433_s20 + $0x10] sm:$0xff] }
 0xa5d   : > { %v4173_v8 = vpop.eup %4172 }
 0xa5e   : > { %v2718_v9 = vmul.f32 %v4173_v8, %v4165_v46  ;;  %v3142_v46 = vld [vmem:[#allocation20 + $0x10] sm:$0xff]  ;;  %v3226_v8 = vld [vmem:[%s5433_s20 + $0x8] sm:$0xff] }
 0xa60   : > { %3909 = vmatmul.mubr.msk.f32.vlgmr.msra.gmra.mxu0 %vm1941_vm3, %v2718_v9  ;;  %v3225_v9 = vld [vmem:[%s5433_s20] sm:$0xff] }
 0xa61   : > { %3919 = vmatpush3.msra.mxu0 %v2365_v5  ;;  %3922 = vmatprep.mubr.msk.f32.mxu0 %vm4636_vm0, %v4635_v0 }
 0xa62   : > { %3920 = vmatprep.subr.mxu0 %v4635_v0 }
 0xaaf   : > { %v2707_v10 = vpop.xlane.xlu0 %2706 }
 0xab0   : > { %4174 = vrcp.f32 %v2707_v10  ;;  %v3667_v10 = vld [vmem:[#allocation22] ss:$0 sm:$0xff] }
 0xab7   : > { %v2710_v4 = vpop.xlane.xlu1 %2709 }
 0xab8   : > { %4176 = vrcp.f32 %v2710_v4 }
 0xabb   : > { %v2713_v11 = vpop.xlane.xlu0 %2712  ;;  %v2369_v15 = vpop.permute.xlu1 %2368 }
 0xabc   : > { %4178 = vrcp.f32 %v2713_v11 }
 0xabd   : > { %v4175_v12 = vpop.eup %4174 }
 0xabe   : > { %v2719_v13 = vmul.f32 %v4175_v12, %v4167_v59 }
 0xabf   : > { %v2363_v14 = vpop.permute.xlu0 %2362 }
 0xac0   : > { %3916 = vmatmul.mubr.msk.f32.vlgmr.msra.gmra.mxu1 %vm1941_vm3, %v2719_v13  ;;  %3921 = vmatpush3.msra.mxu0 %v2363_v14  ;;  %v3669_v14 = vld [vmem:[%s5524_s19] ss:$0 sm:$0xff]  ;;  %s4526_s19 = scalar_lea.vmem %s3362_s0, 128 }
 0xac1   : > { %3926 = vmatpush3.msra.mxu1 %v2371_v6  ;;  %3929 = vmatprep.mubr.msk.f32.mxu1 %vm4636_vm0, %v4635_v0  ;;  %p4527_p8 = scmp.ne.s32.totalorder %s3362_s0, %s4526_s19 }
 0xac2   : > { %3927 = vmatprep.subr.mxu1 %v4635_v0  ;;  %3932 = vmatprep.subr.mxu0 %v4635_v0 }
 0xac3   : > { %3928 = vmatpush3.msra.mxu1 %v2369_v15  ;;  %p4528_p6 = pnand %p4527_p8, %p5528_p1 }
 0xac4   : > { %3943 = vmatprep.subr.mxu1 %v4635_v0 }
 0xac5   : > { %v4177_v16 = vpop.eup %4176  ;;  %p4529_p10 = pneg %p4528_p6 }
 0xac6   : > { %v2720_v17 = vmul.f32 %v4177_v16, %v4169_v61 }
 0xac8   : > { %3923 = vmatmul.mubr.msk.f32.vlgmr.msra.gmra.mxu0 %vm1941_vm3, %v2720_v17 }
 0xac9   : > { %v4179_v18 = vpop.eup %4178  ;;  %3940 = vmatprep.mubr.msk.f32.mxu0 %vm4636_vm0, %v4635_v0  ;;  %3933 = vmatpush3.msra.mxu0 %v2331_v22 }
 0xaca   : > { %v2721_v19 = vmul.f32 %v4179_v18, %v4171_v63  ;;  %3934 = vmatprep.subr.mxu0 %v4635_v0 }
 0xacb   : > { %3935 = vmatpush3.msra.mxu0 %v2330_v23 }
 0xacc   : > { %3930 = vmatmul.mubr.msk.f32.vlgmr.msra.gmra.mxu1 %vm1941_vm3, %v2721_v19  ;;  %3936 = vmatprep.subr.mxu0 %v4635_v0 }
 0xacd   : > { %3951 = vmatprep.mubr.msk.f32.mxu1 %vm4636_vm0, %v4635_v0  ;;  %3937 = vmatpush3.msra.mxu0 %v2329_v24 }
 0xace   : > { %3938 = vmatprep.subr.mxu0 %v4635_v0  ;;  %3944 = vmatpush3.msra.mxu1 %v3143_v45 }
 0xacf   : > { %3939 = vmatpush3.msra.mxu0 %v2328_v26  ;;  %3945 = vmatprep.subr.mxu1 %v4635_v0 }
 0xad0   : > { %3954 = vmatprep.subr.mxu0 %v4635_v0  ;;  %3946 = vmatpush3.msra.mxu1 %v3142_v46 }
 0xad1   : > { %3947 = vmatprep.subr.mxu1 %v4635_v0 }
 0xad2   : > { %3948 = vmatpush3.msra.mxu1 %v3141_v47 }
 0xad3   : > { %3949 = vmatprep.subr.mxu1 %v4635_v0 }
 0xad4   : > { %3950 = vmatpush3.msra.mxu1 %v3140_v48 }
 0xb20   : > { %v2791_v20 = vpop.f32.mrf.mxu0 }
 0xb22   : > { %v3910_v21 = vpop.f32.mrf.mxu0 }
 0xb80   : > { %v2864_v25 = vpop.f32.mrf.mxu1 }
 0xb81   : > { %3015 = vrot.lane.b32.xlu0 %v2864_v25, %s4641_s16 }
 0xb82   : > { %v3917_v27 = vpop.f32.mrf.mxu1 }
 0xb88   : > { %v2937_v28 = vpop.f32.mrf.mxu0 }
 0xb89   : > { %3019 = vrot.lane.b32.xlu1 %v2937_v28, %s4642_s4 }
 0xb8a   : > { %v3924_v29 = vpop.f32.mrf.mxu0 }
 0xb8c   : > { %v3010_v30 = vpop.f32.mrf.mxu1 }
 0xb8d   : > { %3023 = vrot.lane.b32.xlu0 %v3010_v30, %s5523_s27  ;;  %v3671_v30 = vld [vmem:[%s5525_s18] ss:$0 sm:$0xff]  ;;  %s3674_s27 = sshll.u32 %s4811_s10, 7  ;;  %s4532_s10 = scalar_lea.vmem %s4531_s14, 256 }
 0xb8e   : > { %v3931_v31 = vpop.f32.mrf.mxu1  ;;  %s3359_s6 = scalar_lea.hbm %s5527_s7, %s3674_s27  ;;  %p4534_p11 = scmp.lt.s32.totalorder %s4532_s10, %s4526_s19 }
 0xb90   : > { %p4535_p12 = por %p4534_p11, %p4533_p9 }
 0xb92   : > { %p4536_p2 = pnand %p4535_p12, %p4529_p10 }
 0xbf3   : > { %v3016_v32 = vpop.permute.xlu0 %3015 }
 0xbf4   : > { %v3026_v34 = vsel %vm1289_vm2, %v2791_v20, %v3016_v32  ;;  %v3672_v32 = vld [vmem:[%s5526_s15] ss:$0 sm:$0xff] }
 0xbfb   : > { %v3020_v33 = vpop.permute.xlu1 %3019 }
 0xbfc   : > { %v3027_v35 = vsel %vm1941_vm3, %v3026_v34, %v3020_v33 }
 0xbff   : > { %v3024_v36 = vpop.permute.xlu0 %3023 }
 0xc00   : > { %v3028_v37 = vsel %vm1943_vm4, %v3027_v35, %v3024_v36 }
 0xc01   : > { %3941 = vmatmul.mubr.msk.f32.vlgmr.msra.gmra.mxu0 %vm1107_vm1, %v3028_v37 }
 0xc02   : > { %3970 = vmatprep.mubr.msk.f32.mxu0 %vm4636_vm0, %v4635_v0 }
 0xcc1   : > { %v3104_v39 = vpop.f32.mrf.mxu0 }
 0xcc2   : > { %v3105_v40 = vadd.f32 %v3663_v38, %v3104_v39 }
 0xcc3   : > { %v3942_v41 = vpop.f32.mrf.mxu0 }
 0xcc4   : > { %v3108_v3 = vadd.f32 %v3105_v40, %v5217_v2  ;;  %v3232_v2 = vld [vmem:[%s5433_s20 + $0x38] sm:$0xff] }
 0xcc5   : > { %3955 = vmatpush3.msra.mxu0 %v3232_v2 }
 0xcc6   : > { %v3111_v42 = vsel %vm1107_vm1, %v3108_v3, 0.0  ;;  %v3115_v43 = vmul.f32 %v3108_v3, %v3108_v3  ;;  %3956 = vmatprep.subr.mxu0 %v4635_v0 }
 0xcc7   : > { %3112 = vadd.xlane.f32.xlu1 %v3111_v42  ;;  %3957 = vmatpush3.msra.mxu0 %v3231_v49 }
 0xcc8   : > { %v3116_v44 = vsel %vm1107_vm1, %v3115_v43, 0.0  ;;  %3958 = vmatprep.subr.mxu0 %v4635_v0 }
 0xcc9   : > { %3117 = vadd.xlane.f32.xlu0 %v3116_v44  ;;  %3959 = vmatpush3.msra.mxu0 %v3230_v50 }
 0xcca   : > { %3960 = vmatprep.subr.mxu0 %v4635_v0 }
 0xccb   : > { %3961 = vmatpush3.msra.mxu0 %v3229_v51 }
 0xccc   : > { %3962 = vmatprep.subr.mxu0 %v4635_v0 }
 0xccd   : > { %3963 = vmatpush3.msra.mxu0 %v3228_v52 }
 0xcce   : > { %3964 = vmatprep.subr.mxu0 %v4635_v0 }
 0xccf   : > { %3965 = vmatpush3.msra.mxu0 %v3227_v7 }
 0xcd0   : > { %3966 = vmatprep.subr.mxu0 %v4635_v0 }
 0xcd1   : > { %3967 = vmatpush3.msra.mxu0 %v3226_v8 }
 0xcd2   : > { %3968 = vmatprep.subr.mxu0 %v4635_v0 }
 0xcd3   : > { %3969 = vmatpush3.msra.mxu0 %v3225_v9 }
 0xd50   : > { %v3113_v53 = vpop.xlane.xlu1 %3112 }
 0xd51   : > { %v3114_v54 = vmul.f32 0.03125, %v3113_v53 }
 0xd52   : > { %v3118_v55 = vpop.xlane.xlu0 %3117 }
 0xd53   : > { %v3120_v56 = vmul.f32 %v3114_v54, %v3114_v54  ;;  %v3119_v57 = vmul.f32 0.03125, %v3118_v55  ;;  %v3122_v60 = vsub.f32 %v3108_v3, %v3114_v54 }
 0xd55   : > { %v3121_v58 = vsub.f32 %v3119_v57, %v3120_v56 }
 0xd57   : > { %v3123_v59 = vadd.f32 1e-05, %v3121_v58 }
 0xd59   : > { %4180 = vrsqrt.f32 %v3123_v59 }
 0xd66   : > { %v4181_v61 = vpop.eup %4180 }
 0xd67   : > { %v3125_v63 = vmul.f32 %v4181_v61, %v3122_v60 }
 0xd69   : > { %v3132_v5 = vmul.f32 %v3665_v62, %v3125_v63 }
 0xd6b   : > { %v3139_v6 = vadd.f32 %v3666_v1, %v3132_v5 }
 0xd6d   : > { %3952 = vmatmul.mubr.msk.f32.vlgmr.msra.gmra.mxu1 %vm1107_vm1, %v3139_v6 }
 0xe2d   : > { %v3220_v4 = vpop.f32.mrf.mxu1 }
 0xe2e   : > { %v3221_v11 = vadd.f32 %v3667_v10, %v3220_v4 }
 0xe2f   : > { %v3953_v12 = vpop.f32.mrf.mxu1 }
 0xe30   : > { %v3224_v13 = vmax.f32 %v3221_v11, 0.0 }
 0xe32   : > { %3971 = vmatmul.mubr.msk.f32.vlgmr.msra.gmra.mxu0 %vm3240_vm5, %v3224_v13 }
 0xef2   : > { %v3310_v15 = vpop.f32.mrf.mxu0 }
 0xef3   : > { %v3311_v16 = vadd.f32 %v3669_v14, %v3310_v15 }
 0xef4   : > { %v3972_v17 = vpop.f32.mrf.mxu0 }
 0xef5   : > { %v3314_v18 = vadd.f32 %v3311_v16, %v3139_v6 }
 0xef7   : > { %v3317_v19 = vsel %vm1107_vm1, %v3314_v18, 0.0  ;;  %v3321_v20 = vmul.f32 %v3314_v18, %v3314_v18 }
 0xef8   : > { %3318 = vadd.xlane.f32.xlu0 %v3317_v19 }
 0xef9   : > { %v3322_v0 = vsel %vm1107_vm1, %v3321_v20, 0.0 }
 0xefa   : > { %3323 = vadd.xlane.f32.xlu1 %v3322_v0 }
 0xf81   : > { %v3319_v21 = vpop.xlane.xlu0 %3318 }
 0xf82   : > { %v3320_v22 = vmul.f32 0.03125, %v3319_v21 }
 0xf83   : > { %v3324_v23 = vpop.xlane.xlu1 %3323 }
 0xf84   : > { %v3326_v24 = vmul.f32 %v3320_v22, %v3320_v22  ;;  %v3325_v25 = vmul.f32 0.03125, %v3324_v23  ;;  %v3328_v28 = vsub.f32 %v3314_v18, %v3320_v22 }
 0xf86   : > { %v3327_v26 = vsub.f32 %v3325_v25, %v3326_v24 }
 0xf88   : > { %v3329_v27 = vadd.f32 1e-05, %v3327_v26 }
 0xf8a   : > { %4182 = vrsqrt.f32 %v3329_v27 }
 0xf97   : > { %v4183_v29 = vpop.eup %4182 }
 0xf98   : > { %v3331_v31 = vmul.f32 %v4183_v29, %v3328_v28 }
 0xf9a   : > { %v3338_v33 = vmul.f32 %v3671_v30, %v3331_v31 }
 0xf9c   : > { %v3345_v34 = vadd.f32 %v3672_v32, %v3338_v33 }
 0xf9e   : > { %3346 = vst.msk [vmem:[%s1078_s13] sm:$0xff] %vm1107_vm1, %v3345_v34 }
 0xf9f   : > { %4539 = shalt.err (!%p4536_p2)
}
 0xfa0   : > { %s4540_s2 = scalar_lea.hbm %s3359_s6, 128  ;;  %s4544_s29 = scalar_lea.hbm %s5527_s7, 256 }
 0xfa1   : > { %p4541_p13 = scmp.ne.s32.totalorder %s3359_s6, %s4540_s2  ;;  %p4545_p5 = scmp.lt.s32.totalorder %s3359_s6, %s5527_s7 }
 0xfa2   : > { %p4546_p3 = scmp.lt.s32.totalorder %s4544_s29, %s4540_s2 }
 0xfa3   : > { %p4542_p7 = pnand %p4541_p13, %p5528_p1 }
 0xfa4   : > { %p4547_p0 = por %p4546_p3, %p4545_p5 }
 0xfa5   : > { %p4543_p4 = pneg %p4542_p7 }
 0xfa7   : > { %p4548_p8 = pnand %p4547_p0, %p4543_p4 }
 0xfa9   : > { %4551 = shalt.err (!%p4548_p8)
}
 0xfaa   : > { %4021 = dma.vmem_to_hbm [thread:$0]  (%p5528_p1), %s3362_s0, 128, %s3359_s6, %s3348_s1  }
 0xfab PF: > { %s3373_s27 = sand.u32 1, %s4606_s8   ;;  %p5529_p6 = scmp.ne.s32.totalorder %s5498_s3, 0 }
 0xfac   : > { %p5530_p10 = scmp.ge.s32.totalorder %s4618_s30, 2  ;;  %s3374_s13 = scalar_lea.sflag [#allocation4], %s3373_s27 }
 0xfae   : > { %p4065_p9 = pnand %p5530_p10, %p5529_p6 }
 0xfb0   : > { %p4066_p11 = pneg %p4065_p9 }
 0xfb2   : > { %4601 = dma.done.wait (%p4066_p11), %s3374_s13, 128  }
 0xfb3   : > { %4603 = vsyncadd (%p4066_p11), %s3374_s13, 4294967168  ;;  %s5531_s30 = sld [smem:[#allocation34_spill]]  ;;  %s5534_s8 = smov %s4610_s5 }
 0xfb4   : > { %s5532_s16 = sld [smem:[#allocation33_spill]] }
 0xfb5   : > { %s5533_s9 = sld [smem:[#allocation35_spill]] }
 0xfb9   : > { %p49_p12 = scmp.ge.s32.totalorder %s5531_s30, 4  }
 0xfba   : > { %s5535_s5 = smov %s5532_s16 }
 0xfbb   :  { %51 = sbr.rel (!%p49_p12) target bundleno = 37 (0x25), region = 240 }
 0xfc0   :  { %3379 = vsyncpa [#allocation3], 1 }
 0xfc1   :  { %3381 = vsyncpa [#allocation3 + $0x1], 1 }
 0xfc2   :  { %3382 = vsyncpa [#allocation6], 1 }
 0xfc3   :  { %3384 = vsyncpa [#allocation6 + $0x1], 1 }
 0xfc4   :  { %3385 = vsyncpa [#allocation9], 1 }
 0xfc5   :  { %3386 = vsyncpa [#allocation12], 1 }
 0xfc6   :  { %3387 = vsyncpa [#allocation15], 1 }
 0xfc7   :  { %3388 = vsyncpa [#allocation18], 1 }
 0xfc8   :  { %3389 = vsyncpa [#allocation21], 1 }
 0xfc9   :  { %3390 = vsyncpa [#allocation4], 1 }
 0xfca   :  { %3392 = vsyncpa [#allocation4 + $0x1], 1 }

</bundles_post_ra>
